<compile_context>
chip_gen: v5e
topology: v5e:2x2
jax: 0.10.0
libtpu: 0.0.40
codegen_flags: <defaults>
</compile_context>

<pallas_src>
import math
import jax
import jax.numpy as jnp
from jax.experimental import pallas as pl
from jax.experimental.pallas import tpu as pltpu

# ---- small synthetic CLIP-text config --------------------------------------
B, L, D, H, LAYERS, PROJ = 2, 8, 32, 4, 2, 32   # batch, seq, width, heads, layers, proj
HD = D // H
EPS = 1e-5
NEG = -1e30

LAYER_KEYS = ("ln1_w", "ln1_b", "wqkv", "bqkv", "wo", "bo",
              "ln2_w", "ln2_b", "w1", "b1", "w2", "b2")


def _ln(x, g, b):
    mu = jnp.mean(x, axis=-1, keepdims=True)
    var = jnp.mean((x - mu) ** 2, axis=-1, keepdims=True)
    return (x - mu) * jax.lax.rsqrt(var + EPS) * g + b


# ---------------------------- fused Pallas kernel ----------------------------

def fused_kernel(eot_ref,                                     # scalar prefetch (SMEM) (B,)
                 prompts_ref, pos_ref,
                 ln1_w_ref, ln1_b_ref, wqkv_ref, bqkv_ref, wo_ref, bo_ref,
                 ln2_w_ref, ln2_b_ref, w1_ref, b1_ref, w2_ref, b2_ref,
                 lnf_w_ref, lnf_b_ref, proj_ref,
                 out_ref,
                 x_scr):
    """One grid step == one ResidualAttentionBlock; activations live in x_scr."""
    lyr = pl.program_id(0)

    # ---- layer 0: x = prompts + positional_embedding (broadcast over batch) ----
    @pl.when(lyr == 0)
    def _():
        x0 = prompts_ref[...].astype(jnp.float32) + pos_ref[...][None, :, :]
        x_scr[...] = x0.reshape(B * L, D)

    x = x_scr[...]                                            # (B*L, D) f32

    # ---- causal multi-head self-attention (pre-LN) ----
    xl = _ln(x, ln1_w_ref[0], ln1_b_ref[0])
    qkv = jnp.dot(xl, wqkv_ref[0], preferred_element_type=jnp.float32) + bqkv_ref[0]
    q = qkv[:, 0:D] * (1.0 / math.sqrt(HD))
    k = qkv[:, D:2 * D]
    v = qkv[:, 2 * D:3 * D]

    q3 = q.reshape(B, L, D)
    k3 = k.reshape(B, L, D)
    v3 = v.reshape(B, L, D)

    rows = jax.lax.broadcasted_iota(jnp.int32, (L, L), 0)
    cols = jax.lax.broadcasted_iota(jnp.int32, (L, L), 1)
    causal = (cols <= rows)[None, :, :]                       # CLIP triu_(1) mask

    wo = wo_ref[0]                                            # (D, D)
    attn = jnp.zeros((B * L, D), jnp.float32)
    for h in range(H):                                        # heads unrolled; B batched on MXU
        sl = slice(h * HD, (h + 1) * HD)
        s = jnp.einsum('bqd,bkd->bqk', q3[:, :, sl], k3[:, :, sl],
                       preferred_element_type=jnp.float32)    # (B, L, L)
        s = jnp.where(causal, s, NEG)
        s = s - jnp.max(s, axis=-1, keepdims=True)
        e = jnp.exp(s)
        p = e / jnp.sum(e, axis=-1, keepdims=True)
        ctx = jnp.einsum('bqk,bkd->bqd', p, v3[:, :, sl],
                         preferred_element_type=jnp.float32)  # (B, L, HD)
        # accumulate straight through the output projection (== concat @ wo)
        attn = attn + jnp.dot(ctx.reshape(B * L, HD), wo[sl, :],
                              preferred_element_type=jnp.float32)
    x = x + attn + bo_ref[0]

    # ---- MLP: Linear -> QuickGELU -> Linear (pre-LN) ----
    xl2 = _ln(x, ln2_w_ref[0], ln2_b_ref[0])
    h1 = jnp.dot(xl2, w1_ref[0], preferred_element_type=jnp.float32) + b1_ref[0]
    h1 = h1 * jax.nn.sigmoid(1.702 * h1)                      # QuickGELU
    h2 = jnp.dot(h1, w2_ref[0], preferred_element_type=jnp.float32) + b2_ref[0]
    x = x + h2

    x_scr[...] = x                                            # stays resident in VMEM

    # ---- final layer: EOT gather + ln_final + text_projection ----
    @pl.when(lyr == pl.num_programs(0) - 1)
    def _():
        rows_eot = [x_scr[pl.ds(b * L + eot_ref[b], 1), :] for b in range(B)]
        xe = jnp.concatenate(rows_eot, axis=0)                # (B, D)
        xe = _ln(xe, lnf_w_ref[...], lnf_b_ref[...])
        out_ref[...] = jnp.dot(xe, proj_ref[...],
                               preferred_element_type=jnp.float32).astype(out_ref.dtype)


# ------------------------------ wrapper --------------------------------------

def text_encoder(prompts, tokenized_prompts, params):
    eot = jnp.argmax(tokenized_prompts, axis=-1).astype(jnp.int32)   # (B,) scalar prefetch
    layer_ws = [params[k] for k in LAYER_KEYS]

    def lspec(a):          # stacked (LAYERS, ...) -> one layer slab per grid step
        nz = a.ndim - 1
        return pl.BlockSpec((1,) + a.shape[1:], lambda l, e, nz=nz: (l,) + (0,) * nz)

    def fspec(a):          # constant block index -> stays resident across layers
        nd = a.ndim
        return pl.BlockSpec(a.shape, lambda l, e, nd=nd: (0,) * nd)

    in_specs = ([fspec(prompts), fspec(params["pos"])]
                + [lspec(a) for a in layer_ws]
                + [fspec(params["lnf_w"]), fspec(params["lnf_b"]), fspec(params["proj"])])

    grid_spec = pltpu.PrefetchScalarGridSpec(
        num_scalar_prefetch=1,
        grid=(LAYERS,),
        in_specs=in_specs,
        out_specs=pl.BlockSpec((B, PROJ), lambda l, e: (0, 0)),
        scratch_shapes=[pltpu.VMEM((B * L, D), jnp.float32)],
    )

    return pl.pallas_call(
        fused_kernel,
        out_shape=jax.ShapeDtypeStruct((B, PROJ), jnp.float32),
        grid_spec=grid_spec,
        compiler_params=pltpu.CompilerParams(dimension_semantics=("arbitrary",)),
    )(eot, prompts, params["pos"], *layer_ws,
      params["lnf_w"], params["lnf_b"], params["proj"])


# ---------------------------- reference (plain JAX) ---------------------------

def text_encoder_ref(prompts, tok, params):
    x = prompts + params["pos"][None]
    mask = jnp.tril(jnp.ones((L, L), bool))
    for l in range(LAYERS):
        ln1_w, ln1_b = params["ln1_w"][l], params["ln1_b"][l]
        wqkv, bqkv = params["wqkv"][l], params["bqkv"][l]
        wo, bo = params["wo"][l], params["bo"][l]
        ln2_w, ln2_b = params["ln2_w"][l], params["ln2_b"][l]
        w1, b1 = params["w1"][l], params["b1"][l]
        w2, b2 = params["w2"][l], params["b2"][l]

        xl = _ln(x, ln1_w, ln1_b)
        qkv = xl @ wqkv + bqkv
        q, k, v = jnp.split(qkv, 3, axis=-1)
        q = q * (1.0 / math.sqrt(HD))
        qh = q.reshape(B, L, H, HD).transpose(0, 2, 1, 3)
        kh = k.reshape(B, L, H, HD).transpose(0, 2, 1, 3)
        vh = v.reshape(B, L, H, HD).transpose(0, 2, 1, 3)
        s = jnp.einsum('bhqd,bhkd->bhqk', qh, kh)
        s = jnp.where(mask, s, NEG)
        p = jax.nn.softmax(s, axis=-1)
        o = jnp.einsum('bhqk,bhkd->bhqd', p, vh).transpose(0, 2, 1, 3).reshape(B, L, D)
        x = x + o @ wo + bo
        xl2 = _ln(x, ln2_w, ln2_b)
        h1 = xl2 @ w1 + b1
        h1 = h1 * jax.nn.sigmoid(1.702 * h1)
        x = x + h1 @ w2 + b2
    eot = jnp.argmax(tok, -1)
    xe = x[jnp.arange(B), eot]
    xe = _ln(xe, params["lnf_w"], params["lnf_b"])
    return xe @ params["proj"]


# ------------------------------ param init ------------------------------------

def init_params(key):
    def nrm(k, shape, scale=0.02):
        return scale * jax.random.normal(k, shape, jnp.float32)

    keys = iter(jax.random.split(key, 12 * LAYERS + 8))

    def nxt(shape, scale=0.02):
        return nrm(next(keys), shape, scale)

    return {
        # stacked per-layer weights (leading LAYERS axis, 1-D params kept (1, W))
        "ln1_w": jnp.ones((LAYERS, 1, D), jnp.float32) + nxt((LAYERS, 1, D), 0.01),
        "ln1_b": nxt((LAYERS, 1, D), 0.01),
        "wqkv": nxt((LAYERS, D, 3 * D)),            # stored (in, out); math-equivalent
        "bqkv": nxt((LAYERS, 1, 3 * D), 0.01),
        "wo":   nxt((LAYERS, D, D)),
        "bo":   nxt((LAYERS, 1, D), 0.01),
        "ln2_w": jnp.ones((LAYERS, 1, D), jnp.float32) + nxt((LAYERS, 1, D), 0.01),
        "ln2_b": nxt((LAYERS, 1, D), 0.01),
        "w1":   nxt((LAYERS, D, 4 * D)),
        "b1":   nxt((LAYERS, 1, 4 * D), 0.01),
        "w2":   nxt((LAYERS, 4 * D, D)),
        "b2":   nxt((LAYERS, 1, D), 0.01),
        # shared
        "pos":   nxt((L, D), 0.01),
        "lnf_w": jnp.ones((1, D), jnp.float32),
        "lnf_b": jnp.zeros((1, D), jnp.float32),
        "proj":  nxt((D, PROJ)),
    }


if __name__ == "__main__":
    root = jax.random.PRNGKey(0)
    k_p, k_tok, k_par = jax.random.split(root, 3)

    params = init_params(k_par)
    prompts = jax.random.normal(k_p, (B, L, D), jnp.float32)        # token embeddings
    tokenized_prompts = jax.random.randint(k_tok, (B, L), 1, 100)
    # place the EOT token (largest id) at a distinct position per row
    tokenized_prompts = tokenized_prompts.at[0, L - 3].set(49407)
    tokenized_prompts = tokenized_prompts.at[1, L - 1].set(49407)

    out = text_encoder(prompts, tokenized_prompts, params)
    out = jax.block_until_ready(out)

    ref = text_encoder_ref(prompts, tokenized_prompts, params)
    assert out.shape == (B, PROJ)
    assert jnp.allclose(out, ref, atol=1e-3, rtol=1e-3), "mismatch vs reference"

    print("KERNEL_OK")
</pallas_src>

<mosaic_0001>
module attributes {stable_mosaic.version = 11 : i64} {
  func.func @fused_kernel(%arg0: i32, %arg1: memref<2xi32, #tpu.memory_space<smem>>, %arg2: memref<2x8x32xf32, #tpu.memory_space<vmem>>, %arg3: memref<8x32xf32, #tpu.memory_space<vmem>>, %arg4: memref<1x1x32xf32, #tpu.memory_space<vmem>>, %arg5: memref<1x1x32xf32, #tpu.memory_space<vmem>>, %arg6: memref<1x32x96xf32, #tpu.memory_space<vmem>>, %arg7: memref<1x1x96xf32, #tpu.memory_space<vmem>>, %arg8: memref<1x32x32xf32, #tpu.memory_space<vmem>>, %arg9: memref<1x1x32xf32, #tpu.memory_space<vmem>>, %arg10: memref<1x1x32xf32, #tpu.memory_space<vmem>>, %arg11: memref<1x1x32xf32, #tpu.memory_space<vmem>>, %arg12: memref<1x32x128xf32, #tpu.memory_space<vmem>>, %arg13: memref<1x1x128xf32, #tpu.memory_space<vmem>>, %arg14: memref<1x128x32xf32, #tpu.memory_space<vmem>>, %arg15: memref<1x1x32xf32, #tpu.memory_space<vmem>>, %arg16: memref<1x32xf32, #tpu.memory_space<vmem>>, %arg17: memref<1x32xf32, #tpu.memory_space<vmem>>, %arg18: memref<32x32xf32, #tpu.memory_space<vmem>>, %arg19: memref<2x32xf32, #tpu.memory_space<vmem>>, %arg20: memref<16x32xf32, #tpu.memory_space<vmem>>) attributes {dimension_semantics = [#tpu.dimension_semantics<arbitrary>], iteration_bounds = array<i64: 2>, scalar_prefetch = 1 : i64, scratch_operands = 1 : i64, tpu.core_type = #tpu.core_type<tc>, window_params = [{pipeline_mode = #tpu.pipeline_mode<synchronous>, transform_indices = @transform_0, window_bounds = array<i64: 2, 8, 32>}, {pipeline_mode = #tpu.pipeline_mode<synchronous>, transform_indices = @transform_1, window_bounds = array<i64: 8, 32>}, {transform_indices = @transform_2, window_bounds = array<i64: 1, 1, 32>}, {transform_indices = @transform_3, window_bounds = array<i64: 1, 1, 32>}, {transform_indices = @transform_4, window_bounds = array<i64: 1, 32, 96>}, {transform_indices = @transform_5, window_bounds = array<i64: 1, 1, 96>}, {transform_indices = @transform_6, window_bounds = array<i64: 1, 32, 32>}, {transform_indices = @transform_7, window_bounds = array<i64: 1, 1, 32>}, {transform_indices = @transform_8, window_bounds = array<i64: 1, 1, 32>}, {transform_indices = @transform_9, window_bounds = array<i64: 1, 1, 32>}, {transform_indices = @transform_10, window_bounds = array<i64: 1, 32, 128>}, {transform_indices = @transform_11, window_bounds = array<i64: 1, 1, 128>}, {transform_indices = @transform_12, window_bounds = array<i64: 1, 128, 32>}, {transform_indices = @transform_13, window_bounds = array<i64: 1, 1, 32>}, {pipeline_mode = #tpu.pipeline_mode<synchronous>, transform_indices = @transform_14, window_bounds = array<i64: 1, 32>}, {pipeline_mode = #tpu.pipeline_mode<synchronous>, transform_indices = @transform_15, window_bounds = array<i64: 1, 32>}, {pipeline_mode = #tpu.pipeline_mode<synchronous>, transform_indices = @transform_16, window_bounds = array<i64: 32, 32>}, {pipeline_mode = #tpu.pipeline_mode<synchronous>, transform_indices = @transform_17, window_bounds = array<i64: 2, 32>}]} {
    %c0_i32 = arith.constant 0 : i32
    %0 = arith.cmpi eq, %arg0, %c0_i32 : i32
    %1 = arith.extui %0 : i1 to i32
    %c0_i32_0 = arith.constant 0 : i32
    %2 = arith.cmpi ne, %1, %c0_i32_0 : i32
    scf.if %2 {
      %c0_81 = arith.constant 0 : index
      %c0_82 = arith.constant 0 : index
      %c0_83 = arith.constant 0 : index
      %198 = vector.load %arg2[%c0_81, %c0_82, %c0_83] : memref<2x8x32xf32, #tpu.memory_space<vmem>>, vector<2x8x32xf32>
      %c0_84 = arith.constant 0 : index
      %c0_85 = arith.constant 0 : index
      %199 = vector.load %arg3[%c0_84, %c0_85] : memref<8x32xf32, #tpu.memory_space<vmem>>, vector<8x32xf32>
      %200 = vector.shape_cast %199 : vector<8x32xf32> to vector<1x8x32xf32>
      %201 = vector.broadcast %200 : vector<1x8x32xf32> to vector<2x8x32xf32>
      %202 = arith.addf %198, %201 : vector<2x8x32xf32>
      %203 = vector.shape_cast %202 : vector<2x8x32xf32> to vector<16x32xf32>
      %c0_86 = arith.constant 0 : index
      %c0_87 = arith.constant 0 : index
      %204 = vector.load %arg20[%c0_86, %c0_87] : memref<16x32xf32, #tpu.memory_space<vmem>>, vector<16x32xf32>
      tpu.vector_store %arg20[%c0_86, %c0_87], %203 {strides = array<i32>} : memref<16x32xf32, #tpu.memory_space<vmem>>, vector<16x32xf32>,
    } else {
    }
    %c0 = arith.constant 0 : index
    %c0_1 = arith.constant 0 : index
    %3 = vector.load %arg20[%c0, %c0_1] : memref<16x32xf32, #tpu.memory_space<vmem>>, vector<16x32xf32>
    %c0_2 = arith.constant 0 : index
    %c0_3 = arith.constant 0 : index
    %c0_4 = arith.constant 0 : index
    %4 = vector.load %arg4[%c0_2, %c0_3, %c0_4] : memref<1x1x32xf32, #tpu.memory_space<vmem>>, vector<1x1x32xf32>
    %5 = vector.shape_cast %4 : vector<1x1x32xf32> to vector<1x32xf32>
    %c0_5 = arith.constant 0 : index
    %c0_6 = arith.constant 0 : index
    %c0_7 = arith.constant 0 : index
    %6 = vector.load %arg5[%c0_5, %c0_6, %c0_7] : memref<1x1x32xf32, #tpu.memory_space<vmem>>, vector<1x1x32xf32>
    %7 = vector.shape_cast %6 : vector<1x1x32xf32> to vector<1x32xf32>
    %cst = arith.constant dense<0.000000e+00> : vector<16xf32>
    %8 = vector.multi_reduction <add>, %3, %cst [1] : vector<16x32xf32> to vector<16xf32>
    %9 = vector.shape_cast %8 : vector<16xf32> to vector<16x1xf32>
    %cst_8 = arith.constant 3.200000e+01 : f32
    %10 = vector.broadcast %cst_8 : f32 to vector<16x1xf32>
    %11 = arith.divf %9, %10 : vector<16x1xf32>
    %12 = vector.broadcast %11 : vector<16x1xf32> to vector<16x32xf32>
    %13 = arith.subf %3, %12 : vector<16x32xf32>
    %14 = arith.mulf %13, %13 : vector<16x32xf32>
    %cst_9 = arith.constant dense<0.000000e+00> : vector<16xf32>
    %15 = vector.multi_reduction <add>, %14, %cst_9 [1] : vector<16x32xf32> to vector<16xf32>
    %16 = vector.shape_cast %15 : vector<16xf32> to vector<16x1xf32>
    %cst_10 = arith.constant 3.200000e+01 : f32
    %17 = vector.broadcast %cst_10 : f32 to vector<16x1xf32>
    %18 = arith.divf %16, %17 : vector<16x1xf32>
    %19 = vector.broadcast %11 : vector<16x1xf32> to vector<16x32xf32>
    %20 = arith.subf %3, %19 : vector<16x32xf32>
    %cst_11 = arith.constant 9.99999974E-6 : f32
    %21 = vector.broadcast %cst_11 : f32 to vector<16x1xf32>
    %22 = arith.addf %18, %21 : vector<16x1xf32>
    %23 = math.rsqrt %22 : vector<16x1xf32>
    %24 = vector.broadcast %23 : vector<16x1xf32> to vector<16x32xf32>
    %25 = arith.mulf %20, %24 : vector<16x32xf32>
    %26 = vector.broadcast %5 : vector<1x32xf32> to vector<16x32xf32>
    %27 = arith.mulf %25, %26 : vector<16x32xf32>
    %28 = vector.broadcast %7 : vector<1x32xf32> to vector<16x32xf32>
    %29 = arith.addf %27, %28 : vector<16x32xf32>
    %c0_12 = arith.constant 0 : index
    %c0_13 = arith.constant 0 : index
    %c0_14 = arith.constant 0 : index
    %30 = vector.load %arg6[%c0_12, %c0_13, %c0_14] : memref<1x32x96xf32, #tpu.memory_space<vmem>>, vector<1x32x96xf32>
    %31 = vector.shape_cast %30 : vector<1x32x96xf32> to vector<32x96xf32>
    %cst_15 = arith.constant dense<0.000000e+00> : vector<16x96xf32>
    %32 = tpu.matmul %29, %31, %cst_15 {dimension_numbers = #tpu.dot_dimension_numbers<[1], [0], [0], [1], [0, 0, 1, 1], [], []>} : vector<16x32xf32>, vector<32x96xf32>, vector<16x96xf32> -> vector<16x96xf32>
    %c0_16 = arith.constant 0 : index
    %c0_17 = arith.constant 0 : index
    %c0_18 = arith.constant 0 : index
    %33 = vector.load %arg7[%c0_16, %c0_17, %c0_18] : memref<1x1x96xf32, #tpu.memory_space<vmem>>, vector<1x1x96xf32>
    %34 = vector.shape_cast %33 : vector<1x1x96xf32> to vector<1x96xf32>
    %35 = vector.broadcast %34 : vector<1x96xf32> to vector<16x96xf32>
    %36 = arith.addf %32, %35 : vector<16x96xf32>
    %37 = vector.extract_strided_slice %36 {offsets = [0, 0], sizes = [16, 32], strides = [1, 1]} : vector<16x96xf32> to vector<16x32xf32>
    %cst_19 = arith.constant 0.353553385 : f32
    %38 = vector.broadcast %cst_19 : f32 to vector<16x32xf32>
    %39 = arith.mulf %37, %38 : vector<16x32xf32>
    %40 = vector.extract_strided_slice %36 {offsets = [0, 32], sizes = [16, 32], strides = [1, 1]} : vector<16x96xf32> to vector<16x32xf32>
    %41 = vector.extract_strided_slice %36 {offsets = [0, 64], sizes = [16, 32], strides = [1, 1]} : vector<16x96xf32> to vector<16x32xf32>
    %42 = vector.shape_cast %39 : vector<16x32xf32> to vector<2x8x32xf32>
    %43 = vector.shape_cast %40 : vector<16x32xf32> to vector<2x8x32xf32>
    %44 = vector.shape_cast %41 : vector<16x32xf32> to vector<2x8x32xf32>
    %45 = tpu.iota {dimensions = array<i32: 0>} : vector<8x8xi32>
    %46 = tpu.iota {dimensions = array<i32: 1>} : vector<8x8xi32>
    %47 = arith.cmpi sle, %46, %45 : vector<8x8xi32>
    %48 = vector.shape_cast %47 : vector<8x8xi1> to vector<1x8x8xi1>
    %c0_20 = arith.constant 0 : index
    %c0_21 = arith.constant 0 : index
    %c0_22 = arith.constant 0 : index
    %49 = vector.load %arg8[%c0_20, %c0_21, %c0_22] : memref<1x32x32xf32, #tpu.memory_space<vmem>>, vector<1x32x32xf32>
    %50 = vector.shape_cast %49 : vector<1x32x32xf32> to vector<32x32xf32>
    %cst_23 = arith.constant 0.000000e+00 : f32
    %51 = vector.broadcast %cst_23 : f32 to vector<16x32xf32>
    %52 = vector.extract_strided_slice %42 {offsets = [0, 0, 0], sizes = [2, 8, 8], strides = [1, 1, 1]} : vector<2x8x32xf32> to vector<2x8x8xf32>
    %53 = vector.extract_strided_slice %43 {offsets = [0, 0, 0], sizes = [2, 8, 8], strides = [1, 1, 1]} : vector<2x8x32xf32> to vector<2x8x8xf32>
    "tpu.trace_start"() <{level = 10 : i32, message = "bqd,bkd->bqk"}> : () -> ()
    %cst_24 = arith.constant dense<0.000000e+00> : vector<2x8x8xf32>
    %54 = tpu.matmul %52, %53, %cst_24 {dimension_numbers = #tpu.dot_dimension_numbers<[2], [2], [1], [1], [0, 0, 0, 1, 1, 1], [0], [0]>} : vector<2x8x8xf32>, vector<2x8x8xf32>, vector<2x8x8xf32> -> vector<2x8x8xf32>
    %cst_25 = arith.constant -1.000000e+30 : f32
    "tpu.trace_stop"() : () -> ()
    %55 = vector.shape_cast %48 : vector<1x8x8xi1> to vector<1x8x8xi1>
    %56 = vector.broadcast %55 : vector<1x8x8xi1> to vector<2x8x8xi1>
    %57 = vector.broadcast %cst_25 : f32 to vector<2x8x8xf32>
    %58 = arith.select %56, %54, %57 : vector<2x8x8xi1>, vector<2x8x8xf32>
    %cst_26 = arith.constant dense<0xFF800000> : vector<2x8xf32>
    %59 = vector.multi_reduction <maximumf>, %58, %cst_26 [2] : vector<2x8x8xf32> to vector<2x8xf32>
    %60 = vector.shape_cast %59 : vector<2x8xf32> to vector<2x8x1xf32>
    %61 = vector.broadcast %60 : vector<2x8x1xf32> to vector<2x8x8xf32>
    %62 = arith.subf %58, %61 : vector<2x8x8xf32>
    %63 = math.exp %62 : vector<2x8x8xf32>
    %cst_27 = arith.constant dense<0.000000e+00> : vector<2x8xf32>
    %64 = vector.multi_reduction <add>, %63, %cst_27 [2] : vector<2x8x8xf32> to vector<2x8xf32>
    %65 = vector.shape_cast %64 : vector<2x8xf32> to vector<2x8x1xf32>
    %66 = vector.broadcast %65 : vector<2x8x1xf32> to vector<2x8x8xf32>
    %67 = arith.divf %63, %66 : vector<2x8x8xf32>
    %68 = vector.extract_strided_slice %44 {offsets = [0, 0, 0], sizes = [2, 8, 8], strides = [1, 1, 1]} : vector<2x8x32xf32> to vector<2x8x8xf32>
    "tpu.trace_start"() <{level = 10 : i32, message = "bqk,bkd->bqd"}> : () -> ()
    %cst_28 = arith.constant dense<0.000000e+00> : vector<2x8x8xf32>
    %69 = tpu.matmul %67, %68, %cst_28 {dimension_numbers = #tpu.dot_dimension_numbers<[2], [1], [1], [2], [0, 0, 0, 1, 1, 2], [0], [0]>} : vector<2x8x8xf32>, vector<2x8x8xf32>, vector<2x8x8xf32> -> vector<2x8x8xf32>
    "tpu.trace_stop"() : () -> ()
    %70 = vector.shape_cast %69 : vector<2x8x8xf32> to vector<16x8xf32>
    %71 = vector.extract_strided_slice %50 {offsets = [0, 0], sizes = [8, 32], strides = [1, 1]} : vector<32x32xf32> to vector<8x32xf32>
    %cst_29 = arith.constant dense<0.000000e+00> : vector<16x32xf32>
    %72 = tpu.matmul %70, %71, %cst_29 {dimension_numbers = #tpu.dot_dimension_numbers<[1], [0], [0], [1], [0, 0, 1, 1], [], []>} : vector<16x8xf32>, vector<8x32xf32>, vector<16x32xf32> -> vector<16x32xf32>
    %73 = arith.addf %51, %72 : vector<16x32xf32>
    %74 = vector.extract_strided_slice %42 {offsets = [0, 0, 8], sizes = [2, 8, 8], strides = [1, 1, 1]} : vector<2x8x32xf32> to vector<2x8x8xf32>
    %75 = vector.extract_strided_slice %43 {offsets = [0, 0, 8], sizes = [2, 8, 8], strides = [1, 1, 1]} : vector<2x8x32xf32> to vector<2x8x8xf32>
    "tpu.trace_start"() <{level = 10 : i32, message = "bqd,bkd->bqk"}> : () -> ()
    %cst_30 = arith.constant dense<0.000000e+00> : vector<2x8x8xf32>
    %76 = tpu.matmul %74, %75, %cst_30 {dimension_numbers = #tpu.dot_dimension_numbers<[2], [2], [1], [1], [0, 0, 0, 1, 1, 1], [0], [0]>} : vector<2x8x8xf32>, vector<2x8x8xf32>, vector<2x8x8xf32> -> vector<2x8x8xf32>
    %cst_31 = arith.constant -1.000000e+30 : f32
    "tpu.trace_stop"() : () -> ()
    %77 = vector.shape_cast %48 : vector<1x8x8xi1> to vector<1x8x8xi1>
    %78 = vector.broadcast %77 : vector<1x8x8xi1> to vector<2x8x8xi1>
    %79 = vector.broadcast %cst_31 : f32 to vector<2x8x8xf32>
    %80 = arith.select %78, %76, %79 : vector<2x8x8xi1>, vector<2x8x8xf32>
    %cst_32 = arith.constant dense<0xFF800000> : vector<2x8xf32>
    %81 = vector.multi_reduction <maximumf>, %80, %cst_32 [2] : vector<2x8x8xf32> to vector<2x8xf32>
    %82 = vector.shape_cast %81 : vector<2x8xf32> to vector<2x8x1xf32>
    %83 = vector.broadcast %82 : vector<2x8x1xf32> to vector<2x8x8xf32>
    %84 = arith.subf %80, %83 : vector<2x8x8xf32>
    %85 = math.exp %84 : vector<2x8x8xf32>
    %cst_33 = arith.constant dense<0.000000e+00> : vector<2x8xf32>
    %86 = vector.multi_reduction <add>, %85, %cst_33 [2] : vector<2x8x8xf32> to vector<2x8xf32>
    %87 = vector.shape_cast %86 : vector<2x8xf32> to vector<2x8x1xf32>
    %88 = vector.broadcast %87 : vector<2x8x1xf32> to vector<2x8x8xf32>
    %89 = arith.divf %85, %88 : vector<2x8x8xf32>
    %90 = vector.extract_strided_slice %44 {offsets = [0, 0, 8], sizes = [2, 8, 8], strides = [1, 1, 1]} : vector<2x8x32xf32> to vector<2x8x8xf32>
    "tpu.trace_start"() <{level = 10 : i32, message = "bqk,bkd->bqd"}> : () -> ()
    %cst_34 = arith.constant dense<0.000000e+00> : vector<2x8x8xf32>
    %91 = tpu.matmul %89, %90, %cst_34 {dimension_numbers = #tpu.dot_dimension_numbers<[2], [1], [1], [2], [0, 0, 0, 1, 1, 2], [0], [0]>} : vector<2x8x8xf32>, vector<2x8x8xf32>, vector<2x8x8xf32> -> vector<2x8x8xf32>
    "tpu.trace_stop"() : () -> ()
    %92 = vector.shape_cast %91 : vector<2x8x8xf32> to vector<16x8xf32>
    %93 = vector.extract_strided_slice %50 {offsets = [8, 0], sizes = [8, 32], strides = [1, 1]} : vector<32x32xf32> to vector<8x32xf32>
    %cst_35 = arith.constant dense<0.000000e+00> : vector<16x32xf32>
    %94 = tpu.matmul %92, %93, %cst_35 {dimension_numbers = #tpu.dot_dimension_numbers<[1], [0], [0], [1], [0, 0, 1, 1], [], []>} : vector<16x8xf32>, vector<8x32xf32>, vector<16x32xf32> -> vector<16x32xf32>
    %95 = arith.addf %73, %94 : vector<16x32xf32>
    %96 = vector.extract_strided_slice %42 {offsets = [0, 0, 16], sizes = [2, 8, 8], strides = [1, 1, 1]} : vector<2x8x32xf32> to vector<2x8x8xf32>
    %97 = vector.extract_strided_slice %43 {offsets = [0, 0, 16], sizes = [2, 8, 8], strides = [1, 1, 1]} : vector<2x8x32xf32> to vector<2x8x8xf32>
    "tpu.trace_start"() <{level = 10 : i32, message = "bqd,bkd->bqk"}> : () -> ()
    %cst_36 = arith.constant dense<0.000000e+00> : vector<2x8x8xf32>
    %98 = tpu.matmul %96, %97, %cst_36 {dimension_numbers = #tpu.dot_dimension_numbers<[2], [2], [1], [1], [0, 0, 0, 1, 1, 1], [0], [0]>} : vector<2x8x8xf32>, vector<2x8x8xf32>, vector<2x8x8xf32> -> vector<2x8x8xf32>
    %cst_37 = arith.constant -1.000000e+30 : f32
    "tpu.trace_stop"() : () -> ()
    %99 = vector.shape_cast %48 : vector<1x8x8xi1> to vector<1x8x8xi1>
    %100 = vector.broadcast %99 : vector<1x8x8xi1> to vector<2x8x8xi1>
    %101 = vector.broadcast %cst_37 : f32 to vector<2x8x8xf32>
    %102 = arith.select %100, %98, %101 : vector<2x8x8xi1>, vector<2x8x8xf32>
    %cst_38 = arith.constant dense<0xFF800000> : vector<2x8xf32>
    %103 = vector.multi_reduction <maximumf>, %102, %cst_38 [2] : vector<2x8x8xf32> to vector<2x8xf32>
    %104 = vector.shape_cast %103 : vector<2x8xf32> to vector<2x8x1xf32>
    %105 = vector.broadcast %104 : vector<2x8x1xf32> to vector<2x8x8xf32>
    %106 = arith.subf %102, %105 : vector<2x8x8xf32>
    %107 = math.exp %106 : vector<2x8x8xf32>
    %cst_39 = arith.constant dense<0.000000e+00> : vector<2x8xf32>
    %108 = vector.multi_reduction <add>, %107, %cst_39 [2] : vector<2x8x8xf32> to vector<2x8xf32>
    %109 = vector.shape_cast %108 : vector<2x8xf32> to vector<2x8x1xf32>
    %110 = vector.broadcast %109 : vector<2x8x1xf32> to vector<2x8x8xf32>
    %111 = arith.divf %107, %110 : vector<2x8x8xf32>
    %112 = vector.extract_strided_slice %44 {offsets = [0, 0, 16], sizes = [2, 8, 8], strides = [1, 1, 1]} : vector<2x8x32xf32> to vector<2x8x8xf32>
    "tpu.trace_start"() <{level = 10 : i32, message = "bqk,bkd->bqd"}> : () -> ()
    %cst_40 = arith.constant dense<0.000000e+00> : vector<2x8x8xf32>
    %113 = tpu.matmul %111, %112, %cst_40 {dimension_numbers = #tpu.dot_dimension_numbers<[2], [1], [1], [2], [0, 0, 0, 1, 1, 2], [0], [0]>} : vector<2x8x8xf32>, vector<2x8x8xf32>, vector<2x8x8xf32> -> vector<2x8x8xf32>
    "tpu.trace_stop"() : () -> ()
    %114 = vector.shape_cast %113 : vector<2x8x8xf32> to vector<16x8xf32>
    %115 = vector.extract_strided_slice %50 {offsets = [16, 0], sizes = [8, 32], strides = [1, 1]} : vector<32x32xf32> to vector<8x32xf32>
    %cst_41 = arith.constant dense<0.000000e+00> : vector<16x32xf32>
    %116 = tpu.matmul %114, %115, %cst_41 {dimension_numbers = #tpu.dot_dimension_numbers<[1], [0], [0], [1], [0, 0, 1, 1], [], []>} : vector<16x8xf32>, vector<8x32xf32>, vector<16x32xf32> -> vector<16x32xf32>
    %117 = arith.addf %95, %116 : vector<16x32xf32>
    %118 = vector.extract_strided_slice %42 {offsets = [0, 0, 24], sizes = [2, 8, 8], strides = [1, 1, 1]} : vector<2x8x32xf32> to vector<2x8x8xf32>
    %119 = vector.extract_strided_slice %43 {offsets = [0, 0, 24], sizes = [2, 8, 8], strides = [1, 1, 1]} : vector<2x8x32xf32> to vector<2x8x8xf32>
    "tpu.trace_start"() <{level = 10 : i32, message = "bqd,bkd->bqk"}> : () -> ()
    %cst_42 = arith.constant dense<0.000000e+00> : vector<2x8x8xf32>
    %120 = tpu.matmul %118, %119, %cst_42 {dimension_numbers = #tpu.dot_dimension_numbers<[2], [2], [1], [1], [0, 0, 0, 1, 1, 1], [0], [0]>} : vector<2x8x8xf32>, vector<2x8x8xf32>, vector<2x8x8xf32> -> vector<2x8x8xf32>
    %cst_43 = arith.constant -1.000000e+30 : f32
    "tpu.trace_stop"() : () -> ()
    %121 = vector.shape_cast %48 : vector<1x8x8xi1> to vector<1x8x8xi1>
    %122 = vector.broadcast %121 : vector<1x8x8xi1> to vector<2x8x8xi1>
    %123 = vector.broadcast %cst_43 : f32 to vector<2x8x8xf32>
    %124 = arith.select %122, %120, %123 : vector<2x8x8xi1>, vector<2x8x8xf32>
    %cst_44 = arith.constant dense<0xFF800000> : vector<2x8xf32>
    %125 = vector.multi_reduction <maximumf>, %124, %cst_44 [2] : vector<2x8x8xf32> to vector<2x8xf32>
    %126 = vector.shape_cast %125 : vector<2x8xf32> to vector<2x8x1xf32>
    %127 = vector.broadcast %126 : vector<2x8x1xf32> to vector<2x8x8xf32>
    %128 = arith.subf %124, %127 : vector<2x8x8xf32>
    %129 = math.exp %128 : vector<2x8x8xf32>
    %cst_45 = arith.constant dense<0.000000e+00> : vector<2x8xf32>
    %130 = vector.multi_reduction <add>, %129, %cst_45 [2] : vector<2x8x8xf32> to vector<2x8xf32>
    %131 = vector.shape_cast %130 : vector<2x8xf32> to vector<2x8x1xf32>
    %132 = vector.broadcast %131 : vector<2x8x1xf32> to vector<2x8x8xf32>
    %133 = arith.divf %129, %132 : vector<2x8x8xf32>
    %134 = vector.extract_strided_slice %44 {offsets = [0, 0, 24], sizes = [2, 8, 8], strides = [1, 1, 1]} : vector<2x8x32xf32> to vector<2x8x8xf32>
    "tpu.trace_start"() <{level = 10 : i32, message = "bqk,bkd->bqd"}> : () -> ()
    %cst_46 = arith.constant dense<0.000000e+00> : vector<2x8x8xf32>
    %135 = tpu.matmul %133, %134, %cst_46 {dimension_numbers = #tpu.dot_dimension_numbers<[2], [1], [1], [2], [0, 0, 0, 1, 1, 2], [0], [0]>} : vector<2x8x8xf32>, vector<2x8x8xf32>, vector<2x8x8xf32> -> vector<2x8x8xf32>
    "tpu.trace_stop"() : () -> ()
    %136 = vector.shape_cast %135 : vector<2x8x8xf32> to vector<16x8xf32>
    %137 = vector.extract_strided_slice %50 {offsets = [24, 0], sizes = [8, 32], strides = [1, 1]} : vector<32x32xf32> to vector<8x32xf32>
    %cst_47 = arith.constant dense<0.000000e+00> : vector<16x32xf32>
    %138 = tpu.matmul %136, %137, %cst_47 {dimension_numbers = #tpu.dot_dimension_numbers<[1], [0], [0], [1], [0, 0, 1, 1], [], []>} : vector<16x8xf32>, vector<8x32xf32>, vector<16x32xf32> -> vector<16x32xf32>
    %139 = arith.addf %117, %138 : vector<16x32xf32>
    %140 = arith.addf %3, %139 : vector<16x32xf32>
    %c0_48 = arith.constant 0 : index
    %c0_49 = arith.constant 0 : index
    %c0_50 = arith.constant 0 : index
    %141 = vector.load %arg9[%c0_48, %c0_49, %c0_50] : memref<1x1x32xf32, #tpu.memory_space<vmem>>, vector<1x1x32xf32>
    %142 = vector.shape_cast %141 : vector<1x1x32xf32> to vector<1x32xf32>
    %143 = vector.broadcast %142 : vector<1x32xf32> to vector<16x32xf32>
    %144 = arith.addf %140, %143 : vector<16x32xf32>
    %c0_51 = arith.constant 0 : index
    %c0_52 = arith.constant 0 : index
    %c0_53 = arith.constant 0 : index
    %145 = vector.load %arg10[%c0_51, %c0_52, %c0_53] : memref<1x1x32xf32, #tpu.memory_space<vmem>>, vector<1x1x32xf32>
    %146 = vector.shape_cast %145 : vector<1x1x32xf32> to vector<1x32xf32>
    %c0_54 = arith.constant 0 : index
    %c0_55 = arith.constant 0 : index
    %c0_56 = arith.constant 0 : index
    %147 = vector.load %arg11[%c0_54, %c0_55, %c0_56] : memref<1x1x32xf32, #tpu.memory_space<vmem>>, vector<1x1x32xf32>
    %148 = vector.shape_cast %147 : vector<1x1x32xf32> to vector<1x32xf32>
    %cst_57 = arith.constant dense<0.000000e+00> : vector<16xf32>
    %149 = vector.multi_reduction <add>, %144, %cst_57 [1] : vector<16x32xf32> to vector<16xf32>
    %150 = vector.shape_cast %149 : vector<16xf32> to vector<16x1xf32>
    %cst_58 = arith.constant 3.200000e+01 : f32
    %151 = vector.broadcast %cst_58 : f32 to vector<16x1xf32>
    %152 = arith.divf %150, %151 : vector<16x1xf32>
    %153 = vector.broadcast %152 : vector<16x1xf32> to vector<16x32xf32>
    %154 = arith.subf %144, %153 : vector<16x32xf32>
    %155 = arith.mulf %154, %154 : vector<16x32xf32>
    %cst_59 = arith.constant dense<0.000000e+00> : vector<16xf32>
    %156 = vector.multi_reduction <add>, %155, %cst_59 [1] : vector<16x32xf32> to vector<16xf32>
    %157 = vector.shape_cast %156 : vector<16xf32> to vector<16x1xf32>
    %cst_60 = arith.constant 3.200000e+01 : f32
    %158 = vector.broadcast %cst_60 : f32 to vector<16x1xf32>
    %159 = arith.divf %157, %158 : vector<16x1xf32>
    %160 = vector.broadcast %152 : vector<16x1xf32> to vector<16x32xf32>
    %161 = arith.subf %144, %160 : vector<16x32xf32>
    %cst_61 = arith.constant 9.99999974E-6 : f32
    %162 = vector.broadcast %cst_61 : f32 to vector<16x1xf32>
    %163 = arith.addf %159, %162 : vector<16x1xf32>
    %164 = math.rsqrt %163 : vector<16x1xf32>
    %165 = vector.broadcast %164 : vector<16x1xf32> to vector<16x32xf32>
    %166 = arith.mulf %161, %165 : vector<16x32xf32>
    %167 = vector.broadcast %146 : vector<1x32xf32> to vector<16x32xf32>
    %168 = arith.mulf %166, %167 : vector<16x32xf32>
    %169 = vector.broadcast %148 : vector<1x32xf32> to vector<16x32xf32>
    %170 = arith.addf %168, %169 : vector<16x32xf32>
    %c0_62 = arith.constant 0 : index
    %c0_63 = arith.constant 0 : index
    %c0_64 = arith.constant 0 : index
    %171 = vector.load %arg12[%c0_62, %c0_63, %c0_64] : memref<1x32x128xf32, #tpu.memory_space<vmem>>, vector<1x32x128xf32>
    %172 = vector.shape_cast %171 : vector<1x32x128xf32> to vector<32x128xf32>
    %cst_65 = arith.constant dense<0.000000e+00> : vector<16x128xf32>
    %173 = tpu.matmul %170, %172, %cst_65 {dimension_numbers = #tpu.dot_dimension_numbers<[1], [0], [0], [1], [0, 0, 1, 1], [], []>} : vector<16x32xf32>, vector<32x128xf32>, vector<16x128xf32> -> vector<16x128xf32>
    %c0_66 = arith.constant 0 : index
    %c0_67 = arith.constant 0 : index
    %c0_68 = arith.constant 0 : index
    %174 = vector.load %arg13[%c0_66, %c0_67, %c0_68] : memref<1x1x128xf32, #tpu.memory_space<vmem>>, vector<1x1x128xf32>
    %175 = vector.shape_cast %174 : vector<1x1x128xf32> to vector<1x128xf32>
    %176 = vector.broadcast %175 : vector<1x128xf32> to vector<16x128xf32>
    %177 = arith.addf %173, %176 : vector<16x128xf32>
    %cst_69 = arith.constant 1.702000e+00 : f32
    %178 = vector.broadcast %cst_69 : f32 to vector<16x128xf32>
    %179 = arith.mulf %178, %177 : vector<16x128xf32>
    %180 = arith.negf %179 : vector<16x128xf32>
    %181 = math.exp %180 : vector<16x128xf32>
    %cst_70 = arith.constant 1.000000e+00 : f32
    %182 = vector.broadcast %cst_70 : f32 to vector<16x128xf32>
    %183 = arith.addf %182, %181 : vector<16x128xf32>
    %184 = arith.divf %182, %183 : vector<16x128xf32>
    %185 = arith.mulf %177, %184 : vector<16x128xf32>
    %c0_71 = arith.constant 0 : index
    %c0_72 = arith.constant 0 : index
    %c0_73 = arith.constant 0 : index
    %186 = vector.load %arg14[%c0_71, %c0_72, %c0_73] : memref<1x128x32xf32, #tpu.memory_space<vmem>>, vector<1x128x32xf32>
    %187 = vector.shape_cast %186 : vector<1x128x32xf32> to vector<128x32xf32>
    %cst_74 = arith.constant dense<0.000000e+00> : vector<16x32xf32>
    %188 = tpu.matmul %185, %187, %cst_74 {dimension_numbers = #tpu.dot_dimension_numbers<[1], [0], [0], [1], [0, 0, 1, 1], [], []>} : vector<16x128xf32>, vector<128x32xf32>, vector<16x32xf32> -> vector<16x32xf32>
    %c0_75 = arith.constant 0 : index
    %c0_76 = arith.constant 0 : index
    %c0_77 = arith.constant 0 : index
    %189 = vector.load %arg15[%c0_75, %c0_76, %c0_77] : memref<1x1x32xf32, #tpu.memory_space<vmem>>, vector<1x1x32xf32>
    %190 = vector.shape_cast %189 : vector<1x1x32xf32> to vector<1x32xf32>
    %191 = vector.broadcast %190 : vector<1x32xf32> to vector<16x32xf32>
    %192 = arith.addf %188, %191 : vector<16x32xf32>
    %193 = arith.addf %144, %192 : vector<16x32xf32>
    %c0_78 = arith.constant 0 : index
    %c0_79 = arith.constant 0 : index
    %194 = vector.load %arg20[%c0_78, %c0_79] : memref<16x32xf32, #tpu.memory_space<vmem>>, vector<16x32xf32>
    tpu.vector_store %arg20[%c0_78, %c0_79], %193 {strides = array<i32>} : memref<16x32xf32, #tpu.memory_space<vmem>>, vector<16x32xf32>,
    %c1_i32 = arith.constant 1 : i32
    %195 = arith.cmpi eq, %arg0, %c1_i32 : i32
    %196 = arith.extui %195 : i1 to i32
    %c0_i32_80 = arith.constant 0 : i32
    %197 = arith.cmpi ne, %196, %c0_i32_80 : i32
    scf.if %197 {
      %c0_81 = arith.constant 0 : index
      %198 = memref.load %arg1[%c0_81] : memref<2xi32, #tpu.memory_space<smem>>
      %c0_i32_82 = arith.constant 0 : i32
      %199 = arith.addi %c0_i32_82, %198 : i32
      %200 = arith.index_cast %199 : i32 to index
      %c0_83 = arith.constant 0 : index
      %201 = vector.load %arg20[%200, %c0_83] : memref<16x32xf32, #tpu.memory_space<vmem>>, vector<1x32xf32>
      %c1 = arith.constant 1 : index
      %202 = memref.load %arg1[%c1] : memref<2xi32, #tpu.memory_space<smem>>
      %c8_i32 = arith.constant 8 : i32
      %203 = arith.addi %c8_i32, %202 : i32
      %204 = arith.index_cast %203 : i32 to index
      %c0_84 = arith.constant 0 : index
      %205 = vector.load %arg20[%204, %c0_84] : memref<16x32xf32, #tpu.memory_space<vmem>>, vector<1x32xf32>
      %206 = tpu.concatenate %201, %205 in 0 : vector<1x32xf32>, vector<1x32xf32> -> vector<2x32xf32>
      %c0_85 = arith.constant 0 : index
      %c0_86 = arith.constant 0 : index
      %207 = vector.load %arg16[%c0_85, %c0_86] : memref<1x32xf32, #tpu.memory_space<vmem>>, vector<1x32xf32>
      %c0_87 = arith.constant 0 : index
      %c0_88 = arith.constant 0 : index
      %208 = vector.load %arg17[%c0_87, %c0_88] : memref<1x32xf32, #tpu.memory_space<vmem>>, vector<1x32xf32>
      %cst_89 = arith.constant dense<0.000000e+00> : vector<2xf32>
      %209 = vector.multi_reduction <add>, %206, %cst_89 [1] : vector<2x32xf32> to vector<2xf32>
      %210 = vector.shape_cast %209 : vector<2xf32> to vector<2x1xf32>
      %cst_90 = arith.constant 3.200000e+01 : f32
      %211 = vector.broadcast %cst_90 : f32 to vector<2x1xf32>
      %212 = arith.divf %210, %211 : vector<2x1xf32>
      %213 = vector.broadcast %212 : vector<2x1xf32> to vector<2x32xf32>
      %214 = arith.subf %206, %213 : vector<2x32xf32>
      %215 = arith.mulf %214, %214 : vector<2x32xf32>
      %cst_91 = arith.constant dense<0.000000e+00> : vector<2xf32>
      %216 = vector.multi_reduction <add>, %215, %cst_91 [1] : vector<2x32xf32> to vector<2xf32>
      %217 = vector.shape_cast %216 : vector<2xf32> to vector<2x1xf32>
      %cst_92 = arith.constant 3.200000e+01 : f32
      %218 = vector.broadcast %cst_92 : f32 to vector<2x1xf32>
      %219 = arith.divf %217, %218 : vector<2x1xf32>
      %220 = vector.broadcast %212 : vector<2x1xf32> to vector<2x32xf32>
      %221 = arith.subf %206, %220 : vector<2x32xf32>
      %cst_93 = arith.constant 9.99999974E-6 : f32
      %222 = vector.broadcast %cst_93 : f32 to vector<2x1xf32>
      %223 = arith.addf %219, %222 : vector<2x1xf32>
      %224 = math.rsqrt %223 : vector<2x1xf32>
      %225 = vector.broadcast %224 : vector<2x1xf32> to vector<2x32xf32>
      %226 = arith.mulf %221, %225 : vector<2x32xf32>
      %227 = vector.broadcast %207 : vector<1x32xf32> to vector<2x32xf32>
      %228 = arith.mulf %226, %227 : vector<2x32xf32>
      %229 = vector.broadcast %208 : vector<1x32xf32> to vector<2x32xf32>
      %230 = arith.addf %228, %229 : vector<2x32xf32>
      %c0_94 = arith.constant 0 : index
      %c0_95 = arith.constant 0 : index
      %231 = vector.load %arg18[%c0_94, %c0_95] : memref<32x32xf32, #tpu.memory_space<vmem>>, vector<32x32xf32>
      %cst_96 = arith.constant dense<0.000000e+00> : vector<2x32xf32>
      %232 = tpu.matmul %230, %231, %cst_96 {dimension_numbers = #tpu.dot_dimension_numbers<[1], [0], [0], [1], [0, 0, 1, 1], [], []>} : vector<2x32xf32>, vector<32x32xf32>, vector<2x32xf32> -> vector<2x32xf32>
      %c0_97 = arith.constant 0 : index
      %c0_98 = arith.constant 0 : index
      %233 = vector.load %arg19[%c0_97, %c0_98] : memref<2x32xf32, #tpu.memory_space<vmem>>, vector<2x32xf32>
      tpu.vector_store %arg19[%c0_97, %c0_98], %232 {strides = array<i32>} : memref<2x32xf32, #tpu.memory_space<vmem>>, vector<2x32xf32>,
    } else {
    }
    return
  }
  func.func @transform_0(%arg0: i32, %arg1: memref<2xi32, #tpu.memory_space<smem>>) -> (i32, i32, i32) {
    %c0_i32 = arith.constant 0 : i32
    %c0_i32_0 = arith.constant 0 : i32
    %c0_i32_1 = arith.constant 0 : i32
    %c0_i32_2 = arith.constant 0 : i32
    return %c0_i32, %c0_i32_0, %c0_i32_1 : i32, i32, i32
  }
  func.func @transform_1(%arg0: i32, %arg1: memref<2xi32, #tpu.memory_space<smem>>) -> (i32, i32) {
    %c0_i32 = arith.constant 0 : i32
    %c0_i32_0 = arith.constant 0 : i32
    %c0_i32_1 = arith.constant 0 : i32
    return %c0_i32, %c0_i32_0 : i32, i32
  }
  func.func @transform_2(%arg0: i32, %arg1: memref<2xi32, #tpu.memory_space<smem>>) -> (i32, i32, i32) {
    %c0_i32 = arith.constant 0 : i32
    %c0_i32_0 = arith.constant 0 : i32
    %c0_i32_1 = arith.constant 0 : i32
    return %arg0, %c0_i32, %c0_i32_0 : i32, i32, i32
  }
  func.func @transform_3(%arg0: i32, %arg1: memref<2xi32, #tpu.memory_space<smem>>) -> (i32, i32, i32) {
    %c0_i32 = arith.constant 0 : i32
    %c0_i32_0 = arith.constant 0 : i32
    %c0_i32_1 = arith.constant 0 : i32
    return %arg0, %c0_i32, %c0_i32_0 : i32, i32, i32
  }
  func.func @transform_4(%arg0: i32, %arg1: memref<2xi32, #tpu.memory_space<smem>>) -> (i32, i32, i32) {
    %c0_i32 = arith.constant 0 : i32
    %c0_i32_0 = arith.constant 0 : i32
    %c0_i32_1 = arith.constant 0 : i32
    return %arg0, %c0_i32, %c0_i32_0 : i32, i32, i32
  }
  func.func @transform_5(%arg0: i32, %arg1: memref<2xi32, #tpu.memory_space<smem>>) -> (i32, i32, i32) {
    %c0_i32 = arith.constant 0 : i32
    %c0_i32_0 = arith.constant 0 : i32
    %c0_i32_1 = arith.constant 0 : i32
    return %arg0, %c0_i32, %c0_i32_0 : i32, i32, i32
  }
  func.func @transform_6(%arg0: i32, %arg1: memref<2xi32, #tpu.memory_space<smem>>) -> (i32, i32, i32) {
    %c0_i32 = arith.constant 0 : i32
    %c0_i32_0 = arith.constant 0 : i32
    %c0_i32_1 = arith.constant 0 : i32
    return %arg0, %c0_i32, %c0_i32_0 : i32, i32, i32
  }
  func.func @transform_7(%arg0: i32, %arg1: memref<2xi32, #tpu.memory_space<smem>>) -> (i32, i32, i32) {
    %c0_i32 = arith.constant 0 : i32
    %c0_i32_0 = arith.constant 0 : i32
    %c0_i32_1 = arith.constant 0 : i32
    return %arg0, %c0_i32, %c0_i32_0 : i32, i32, i32
  }
  func.func @transform_8(%arg0: i32, %arg1: memref<2xi32, #tpu.memory_space<smem>>) -> (i32, i32, i32) {
    %c0_i32 = arith.constant 0 : i32
    %c0_i32_0 = arith.constant 0 : i32
    %c0_i32_1 = arith.constant 0 : i32
    return %arg0, %c0_i32, %c0_i32_0 : i32, i32, i32
  }
  func.func @transform_9(%arg0: i32, %arg1: memref<2xi32, #tpu.memory_space<smem>>) -> (i32, i32, i32) {
    %c0_i32 = arith.constant 0 : i32
    %c0_i32_0 = arith.constant 0 : i32
    %c0_i32_1 = arith.constant 0 : i32
    return %arg0, %c0_i32, %c0_i32_0 : i32, i32, i32
  }
  func.func @transform_10(%arg0: i32, %arg1: memref<2xi32, #tpu.memory_space<smem>>) -> (i32, i32, i32) {
    %c0_i32 = arith.constant 0 : i32
    %c0_i32_0 = arith.constant 0 : i32
    %c0_i32_1 = arith.constant 0 : i32
    return %arg0, %c0_i32, %c0_i32_0 : i32, i32, i32
  }
  func.func @transform_11(%arg0: i32, %arg1: memref<2xi32, #tpu.memory_space<smem>>) -> (i32, i32, i32) {
    %c0_i32 = arith.constant 0 : i32
    %c0_i32_0 = arith.constant 0 : i32
    %c0_i32_1 = arith.constant 0 : i32
    return %arg0, %c0_i32, %c0_i32_0 : i32, i32, i32
  }
  func.func @transform_12(%arg0: i32, %arg1: memref<2xi32, #tpu.memory_space<smem>>) -> (i32, i32, i32) {
    %c0_i32 = arith.constant 0 : i32
    %c0_i32_0 = arith.constant 0 : i32
    %c0_i32_1 = arith.constant 0 : i32
    return %arg0, %c0_i32, %c0_i32_0 : i32, i32, i32
  }
  func.func @transform_13(%arg0: i32, %arg1: memref<2xi32, #tpu.memory_space<smem>>) -> (i32, i32, i32) {
    %c0_i32 = arith.constant 0 : i32
    %c0_i32_0 = arith.constant 0 : i32
    %c0_i32_1 = arith.constant 0 : i32
    return %arg0, %c0_i32, %c0_i32_0 : i32, i32, i32
  }
  func.func @transform_14(%arg0: i32, %arg1: memref<2xi32, #tpu.memory_space<smem>>) -> (i32, i32) {
    %c0_i32 = arith.constant 0 : i32
    %c0_i32_0 = arith.constant 0 : i32
    %c0_i32_1 = arith.constant 0 : i32
    return %c0_i32, %c0_i32_0 : i32, i32
  }
  func.func @transform_15(%arg0: i32, %arg1: memref<2xi32, #tpu.memory_space<smem>>) -> (i32, i32) {
    %c0_i32 = arith.constant 0 : i32
    %c0_i32_0 = arith.constant 0 : i32
    %c0_i32_1 = arith.constant 0 : i32
    return %c0_i32, %c0_i32_0 : i32, i32
  }
  func.func @transform_16(%arg0: i32, %arg1: memref<2xi32, #tpu.memory_space<smem>>) -> (i32, i32) {
    %c0_i32 = arith.constant 0 : i32
    %c0_i32_0 = arith.constant 0 : i32
    %c0_i32_1 = arith.constant 0 : i32
    return %c0_i32, %c0_i32_0 : i32, i32
  }
  func.func @transform_17(%arg0: i32, %arg1: memref<2xi32, #tpu.memory_space<smem>>) -> (i32, i32) {
    %c0_i32 = arith.constant 0 : i32
    %c0_i32_0 = arith.constant 0 : i32
    %c0_i32_1 = arith.constant 0 : i32
    return %c0_i32, %c0_i32_0 : i32, i32
  }
}

</mosaic_0001>

<bundles_post_ra>
// kernel: tpu_custom_call.1
= control target key start
LH: loop header
LB: loop body
LE: loop exit
PB: predicated region body
PF: predicated region fallthrough
CT: control target
= control target key end

     0   :  { %s2230_s30 = smov [#allocation4]   ;;  %s2695_s0 = inlined_call_operand.vmem [shape: s32[2], index: 0, kind: input, shape index: {}]   ;;  %s2696_s1 = inlined_call_operand.vmem [shape: f32[2,8,32], index: 1, kind: input, shape index: {}]   ;;  %s2697_s2 = inlined_call_operand.vmem [shape: f32[8,32], index: 2, kind: input, shape index: {}]   ;;  %s2698_s3 = inlined_call_operand.vmem [shape: f32[2,1,32], index: 3, kind: input, shape index: {}]   ;;  %s2699_s4 = inlined_call_operand.vmem [shape: f32[2,1,32], index: 4, kind: input, shape index: {}]   ;;  %s2700_s5 = inlined_call_operand.vmem [shape: f32[2,32,96], index: 5, kind: input, shape index: {}]   ;;  %s2701_s6 = inlined_call_operand.vmem [shape: f32[2,1,96], index: 6, kind: input, shape index: {}]   ;;  %s2702_s7 = inlined_call_operand.vmem [shape: f32[2,32,32], index: 7, kind: input, shape index: {}]   ;;  %s2703_s8 = inlined_call_operand.vmem [shape: f32[2,1,32], index: 8, kind: input, shape index: {}]   ;;  %s2704_s9 = inlined_call_operand.vmem [shape: f32[2,1,32], index: 9, kind: input, shape index: {}]   ;;  %s2705_s10 = inlined_call_operand.vmem [shape: f32[2,1,32], index: 10, kind: input, shape index: {}]   ;;  %s2706_s11 = inlined_call_operand.vmem [shape: f32[2,32,128], index: 11, kind: input, shape index: {}]   ;;  %s2707_s12 = inlined_call_operand.vmem [shape: f32[2,1,128], index: 12, kind: input, shape index: {}]   ;;  %s2708_s13 = inlined_call_operand.vmem [shape: f32[2,128,32], index: 13, kind: input, shape index: {}]   ;;  %s2709_s14 = inlined_call_operand.vmem [shape: f32[2,1,32], index: 14, kind: input, shape index: {}]   ;;  %s2710_s15 = inlined_call_operand.vmem [shape: f32[1,32], index: 15, kind: input, shape index: {}]   ;;  %s2711_s16 = inlined_call_operand.vmem [shape: f32[1,32], index: 16, kind: input, shape index: {}]   ;;  %s2712_s17 = inlined_call_operand.vmem [shape: f32[32,32], index: 17, kind: input, shape index: {}]   ;;  %s2713_s18 = inlined_call_operand.hbm [shape: f32[2,32], index: 18, kind: output, shape index: {}]  }
   0x1   :  { %2717 = sst [smem:[#allocation10_spill]] %s2695_s0 }
   0x2   :  { %2718 = sst [smem:[#allocation11_spill]] %s2696_s1 }
   0x3   :  { %2719 = sst [smem:[#allocation12_spill]] %s2697_s2 }
   0x4   :  { %2720 = sst [smem:[#allocation13_spill]] %s2700_s5 }
   0x5   :  { %2721 = sst [smem:[#allocation14_spill]] %s2702_s7 }
   0x6   :  { %2722 = sst [smem:[#allocation15_spill]] %s2707_s12 }
   0x7   :  { %2723 = sst [smem:[#allocation16_spill]] %s2710_s15 }
   0x8   :  { %2724 = sst [smem:[#allocation17_spill]] %s2711_s16 }
   0x9   :  { %2725 = sst [smem:[#allocation18_spill]] %s2712_s17 }
   0xa   :  { %2726 = sst [smem:[#allocation19_spill]] %s2713_s18 }
   0xb   :  { %s2727_s29 = sld [smem:[#allocation10_spill]] }
  0x11   :  { %s24_s12 = sshll.u32 %s2727_s29, 4  ;;  %s25_s12 = int_to_ptr.vmem [resolvable:$true] %s24_s12 }
  0x12   :  { %27 = dma.vmem_to_smem %s25_s12, 16, %s2230_s30, [#allocation3] }
  0x13   :  { %2220 = dma.done.wait [#allocation3], 16 }
  0x14   :  { %2221 = vsyncadd [#allocation3], 4294967280 }
  0x15   :  { %30 = sfence }
  0x16   :  { %31 = vsyncpa [#allocation6], 0  ;;  %s2342_s0 = smov 0  }
  0x17 LB: > { %2728 = sst [smem:[#allocation9_spill]] %s2228_s0  ;;  %s2348_s19 = sadd.s32 4294967295, %s2228_s0   ;;  %s2228_s0 = sphi %s2342_s0, %s37_s0  }
  0x18   : > { %p2026_p0 = scmp.ge.s32.totalorder %s2228_s0, 1  ;;  %p586_p1 = scmp.lt.s32.totalorder %s2228_s0, 3 }
  0x1a   : > { %p587_p2 = pnand %p2026_p0, %p586_p1 }
  0x1b   : > { %p672_p3 = scmp.lt.s32.totalorder (!%p587_p2), %s2348_s19, 1  ;;  %s2729_s5 = sld [smem:[#allocation13_spill]] (!%p587_p2) }
  0x1c   : > { %590 = sbr.rel (%p587_p2) target bundleno = 3027 (0xbd3), region = 88  ;;  %s2730_s7 = sld [smem:[#allocation14_spill]] (!%p587_p2) }
  0x1d   : > { %p2035_p4 = scmp.ne.s32.totalorder (!%p587_p2), %s2348_s19, 0 }
  0x21   : > { %s2354_s12 = scalar_select %p672_p3, %s2348_s19, 1 }
  0x22   : > { %s2732_s28 = sld [smem:[#allocation11_spill]] (!%p2035_p4) }
  0x23   : > { %s2082_s24 = sshll.u32 %s2354_s12, 5  ;;  %s696_s16 = scalar_lea.vmem %s2704_s9, %s2354_s12 }
  0x24   : > { %s2372_s30 = scalar_lea.vmem %s2729_s5, %s2082_s24  ;;  %s2377_s0 = scalar_lea.vmem %s2730_s7, %s2082_s24 }
  0x25   : > { %s699_s27 = scalar_lea.vmem %s2705_s10, %s2354_s12  ;;  %s2394_s5 = scalar_lea.vmem %s2706_s11, %s2082_s24 }
  0x26   : > { %s2731_s7 = sld [smem:[#allocation15_spill]]  ;;  %s2085_s17 = sshll.u32 %s2354_s12, 7 }
  0x27   : > { %s2404_s22 = scalar_lea.vmem %s2708_s13, %s2085_s17  ;;  %s715_s25 = scalar_lea.vmem %s2709_s14, %s2354_s12 }
  0x28   : > { %719 = sbr.rel (%p2035_p4) target bundleno = 55 (0x37), region = 92 }
  0x2c   : > { %s707_s15 = scalar_lea.vmem %s2731_s7, %s2354_s12  ;;  %s2733_s7 = sld [smem:[#allocation12_spill]] (!%p2035_p4) }
  0x2d   : > { %v720_v0 = vld [vmem:[%s2732_s28] sm:$0xff]  ;;  %vm725_vm0 = vcmask 261120   ;;  %v721_v2 = vld [vmem:[%s2732_s28 + $0x8] sm:$0xff] }
  0x32   : > { %v722_v1 = vld [vmem:[%s2733_s7] sm:$0xff] }
  0x33   : > { %v723_v3 = vadd.f32 %v722_v1, %v720_v0  ;;  %v724_v4 = vadd.f32 %v722_v1, %v721_v2 }
  0x35   : > { %726 = vst.msk [vmem:[#allocation2] sm:$0xff] %vm725_vm0, %v723_v3 }
  0x36   : > { %727 = vst.msk [vmem:[#allocation2 + $0x8] sm:$0xff] %vm725_vm0, %v724_v4 }
  0x37 PF: > { %vm732_vm1 = vcmask 261120   ;;  %v2231_v9 = vmov 32.0   ;;  %v797_v26 = vld [vmem:[%s2372_s30 + $0x18] sm:$0xff]  ;;  %v796_v27 = vld [vmem:[%s2372_s30 + $0x10] sm:$0xff]  ;;  %v795_v28 = vld [vmem:[%s2372_s30 + $0x8] sm:$0xff]  ;;  %s2734_s21 = scalar_lea.vmem %s2698_s3, %s2354_s12  ;;  %s2735_s26 = scalar_lea.vmem %s2699_s4, %s2354_s12  ;;  %vm845_vm9 = vcmask 64512  }
  0x38   : > { %2122 = vrcp.f32 %v2231_v9  ;;  %820 = vmatpush.msra.mxu0 %v797_v26  ;;  %v794_v29 = vld [vmem:[%s2372_s30] sm:$0xff]  ;;  %s2736_s1 = scalar_lea.vmem %s2701_s6, %s2354_s12  ;;  %s2232_s7 = smov 88   ;;  %v833_v9 = vlaneseq }
  0x39   : > { %v2114_v44 = vld [vmem:[%s2734_s21] ss:$0 sm:$0xff]  ;;  %s2233_s20 = smov 96   ;;  %s2234_s18 = smov 120  }
  0x3a   : > { %821 = vmatpush.msra.mxu0 %v796_v27  ;;  %v2115_v48 = vld [vmem:[%s2735_s26] ss:$0 sm:$0xff]  ;;  %s2235_s17 = smov 64   ;;  %s2236_s30 = smov 112  }
  0x3b   : > { %v2116_v58 = vld [vmem:[%s2736_s1] ss:$0 sm:$0xff]  ;;  %s2237_s21 = smov 56   ;;  %s2238_s23 = smov 80  }
  0x3c   : > { %v2420_v5 = vld [vmem:[#allocation2] sm:$0xff]  ;;  %822 = vmatpush.msra.mxu0 %v795_v28  ;;  %s2239_s2 = smov 72   ;;  %s2240_s26 = smov 48  }
  0x3d   : > { %v733_v6 = vsel %vm732_vm1, %v2420_v5, 0.0  ;;  %v2424_v7 = vld [vmem:[#allocation2 + $0x8] sm:$0xff]  ;;  %s2241_s24 = smov 104   ;;  %s2242_s29 = smov 40  }
  0x3e   : > { %734 = vadd.xlane.f32.xlu0 %v733_v6  ;;  %v736_v8 = vsel %vm732_vm1, %v2424_v7, 0.0  ;;  %v2123_v10 = vpop.eup %2122  ;;  %823 = vmatpush.msra.mxu0 %v794_v29  ;;  %p2074_p5 = scmp.ne.s32.totalorder %s2348_s19, 1 }
  0x3f   : > { %v740_v11 = vmul.f32 32.0, %v2123_v10  ;;  %vm744_vm2 = vweird.f32 %v2123_v10 }
  0x41   : > { %v741_v12 = vsub.f32 1.0, %v740_v11  ;;  %v836_v11 = vand.u32 127, %v833_v9 }
  0x43   : > { %v742_v13 = vmul.f32 %v2123_v10, %v741_v12 }
  0x45   : > { %v743_v14 = vadd.f32 %v2123_v10, %v742_v13 }
  0x46   : > { %737 = vadd.xlane.f32.xlu0 %v736_v8 }
  0x47   : > { %v2428_v15 = vsel %vm744_vm2, %v2123_v10, %v743_v14  ;;  %v834_v10 = vshrl.u32 %v833_v9, 7 }
  0x49   : > { %vm2485_vm10 = vcmp.le.s32.totalorder %v836_v11, %v834_v10 }
  0xb1   : > { %v735_v16 = vpop.xlane.xlu0 %734 }
  0xb2   : > { %v746_v17 = vmul.f32 %v2428_v15, %v735_v16 }
  0xb4   : > { %v748_v18 = vsub.f32 %v2420_v5, %v746_v17 }
  0xb6   : > { %v750_v19 = vmul.f32 %v748_v18, %v748_v18 }
  0xb8   : > { %v752_v20 = vsel %vm732_vm1, %v750_v19, 0.0 }
  0xb9   : > { %753 = vadd.xlane.f32.xlu1 %v752_v20  ;;  %v738_v21 = vpop.xlane.xlu0 %737 }
  0xba   : > { %v747_v22 = vmul.f32 %v2428_v15, %v738_v21 }
  0xbc   : > { %v749_v23 = vsub.f32 %v2424_v7, %v747_v22 }
  0xbe   : > { %v751_v24 = vmul.f32 %v749_v23, %v749_v23 }
  0xc0   : > { %v755_v25 = vsel %vm732_vm1, %v751_v24, 0.0 }
  0xc1   : > { %756 = vadd.xlane.f32.xlu1 %v755_v25 }
 0x12c   : > { %v754_v30 = vpop.xlane.xlu1 %753 }
 0x12d   : > { %v758_v31 = vmul.f32 %v754_v30, %v2428_v15 }
 0x12f   : > { %v760_v32 = vadd.f32 1e-05, %v758_v31 }
 0x131   : > { %2124 = vrsqrt.f32 %v760_v32  ;;  %vm768_vm4 = vweird.f32 %v760_v32 }
 0x134   : > { %v757_v33 = vpop.xlane.xlu1 %756 }
 0x135   : > { %v759_v34 = vmul.f32 %v757_v33, %v2428_v15 }
 0x137   : > { %v2125_v35 = vpop.eup %2124  ;;  %v761_v36 = vadd.f32 1e-05, %v759_v34 }
 0x138   : > { %v763_v37 = vmul.f32 %v2125_v35, %v760_v32  ;;  %vm769_vm3 = vweird.f32 %v2125_v35 }
 0x139   : > { %2126 = vrsqrt.f32 %v761_v36  ;;  %vm770_vm5 = vmor %vm768_vm4, %vm769_vm3  ;;  %vm778_vm7 = vweird.f32 %v761_v36 }
 0x13a   : > { %v764_v38 = vmul.f32 %v2125_v35, %v763_v37 }
 0x13c   : > { %v765_v39 = vmul.f32 0.5, %v764_v38 }
 0x13e   : > { %v766_v40 = vsub.f32 1.5, %v765_v39 }
 0x13f   : > { %v2127_v41 = vpop.eup %2126 }
 0x140   : > { %v767_v42 = vmul.f32 %v2125_v35, %v766_v40  ;;  %v773_v43 = vmul.f32 %v2127_v41, %v761_v36  ;;  %vm779_vm6 = vweird.f32 %v2127_v41 }
 0x141   : > { %vm780_vm8 = vmor %vm778_vm7, %vm779_vm6 }
 0x142   : > { %v771_v45 = vsel %vm770_vm5, %v2125_v35, %v767_v42  ;;  %v774_v46 = vmul.f32 %v2127_v41, %v773_v43 }
 0x143   : > { %v782_v47 = vmul.f32 %v771_v45, %v748_v18 }
 0x144   : > { %v775_v49 = vmul.f32 0.5, %v774_v46 }
 0x145   : > { %v787_v50 = vmul.f32 %v2114_v44, %v782_v47 }
 0x146   : > { %v776_v51 = vsub.f32 1.5, %v775_v49 }
 0x147   : > { %v792_v52 = vadd.f32 %v2115_v48, %v787_v50 }
 0x148   : > { %v777_v53 = vmul.f32 %v2127_v41, %v776_v51 }
 0x149   : > { %2036 = vmatmul.msk.f32.vlgmr.msra.gmra.mxu0 %vm732_vm1, %v792_v52 }
 0x14a   : > { %v781_v54 = vsel %vm780_vm8, %v2127_v41, %v777_v53 }
 0x14b   : > { %v783_v55 = vmul.f32 %v781_v54, %v749_v23 }
 0x14d   : > { %v788_v56 = vmul.f32 %v2114_v44, %v783_v55 }
 0x14f   : > { %v793_v57 = vadd.f32 %v2115_v48, %v788_v56 }
 0x151   : > { %2037 = vmatmul.msk.f32.gmra.mxu0 %vm732_vm1, %v793_v57 }
 0x1c6   : > { %v825_v59 = vpop.f32.mrf.mxu0 }
 0x1c7   : > { %v2459_v60 = vadd.f32 %v2116_v58, %v825_v59 }
 0x1c9   : > { %1005 = vrot.lane.b32.xlu0 %v2459_v60, %s2232_s7  ;;  %843 = vrot.lane.b32.xlu2 %v2459_v60, %s2233_s20  ;;  %v2464_v61 = vmul.f32 0.35355338, %v2459_v60 }
 0x1cb   : > { %1003 = vrot.lane.b32.xlu1 %v2464_v61, %s2234_s18 }
 0x1ce   : > { %v828_v62 = vpop.f32.mrf.mxu0 }
 0x1cf   : > { %v2467_v63 = vadd.f32 %v2116_v58, %v828_v62 }
 0x1d1   : > { %872 = vrot.lane.b32.xlu2 %v2467_v63, %s2233_s20  ;;  %v2472_v0 = vmul.f32 0.35355338, %v2467_v63  ;;  %s2739_s20 = scalar_lea.vmem %s2703_s8, %s2354_s12 }
 0x1d9   : > { %1033 = vrot.lane.b32.xlu2 %v2467_v63, %s2232_s7 }
 0x1e1   : > { %1031 = vrot.lane.b32.xlu2 %v2472_v0, %s2234_s18 }
 0x223   : > { %v844_v1 = vpop.permute.xlu2 %843 }
 0x224   : > { %2038 = vmatpush.xpose.msk.msra.mxu1 %vm845_vm9, %v844_v1 }
 0x227   : > { %2039 = vmatmul.msk.f32.vlgmr.msra.gmra.mxu1 %vm845_vm9, %v2464_v61 }
 0x22b   : > { %v873_v2 = vpop.permute.xlu2 %872 }
 0x22c   : > { %2040 = vmatpush.xpose.msk.msra.mxu2 %vm845_vm9, %v873_v2 }
 0x22f   : > { %2041 = vmatmul.msk.f32.vlgmr.msra.gmra.mxu2 %vm845_vm9, %v2472_v0 }
 0x233   : > { %v1034_v3 = vpop.permute.xlu2 %1033 }
 0x234   : > { %2046 = vmatpush.xpose.msk.msrb.mxu2 %vm845_vm9, %v1034_v3 }
 0x23b   : > { %v1032_v4 = vpop.permute.xlu2 %1031  ;;  %v1006_v6 = vpop.permute.xlu0 %1005 }
 0x23c   : > { %2044 = vmatpush.xpose.msk.msrb.mxu1 %vm845_vm9, %v1006_v6  ;;  %2047 = vmatmul.msk.f32.vlgmr.msrb.gmra.mxu2 %vm845_vm9, %v1032_v4 }
 0x23d   : > { %v1004_v8 = vpop.permute.xlu1 %1003 }
 0x23f   : > { %2045 = vmatmul.msk.f32.vlgmr.msrb.gmra.mxu1 %vm845_vm9, %v1004_v8 }
 0x2a4   : > { %v868_v13 = vpop.f32.mrf.mxu1 }
 0x2a5   : > { %v901_v14 = vsel %vm2485_vm10, %v868_v13, -1e+30 }
 0x2a6   : > { %v903_v16 = vsel %vm845_vm9, %v901_v14, -inf }
 0x2a7   : > { %904 = vmax.xlane.f32.xlu2 %v903_v16 }
 0x2b2   : > { %v896_v17 = vpop.f32.mrf.mxu2 }
 0x2b3   : > { %v902_v18 = vsel %vm2485_vm10, %v896_v17, -1e+30 }
 0x2b4   : > { %v906_v19 = vsel %vm845_vm9, %v902_v18, -inf }
 0x2b5   : > { %907 = vmax.xlane.f32.xlu0 %v906_v19 }
 0x2bc   : > { %v1028_v20 = vpop.f32.mrf.mxu1 }
 0x2bd   : > { %v1059_v21 = vsel %vm2485_vm10, %v1028_v20, -1e+30 }
 0x2be   : > { %v1061_v22 = vsel %vm845_vm9, %v1059_v21, -inf }
 0x2bf   : > { %1062 = vmax.xlane.f32.xlu1 %v1061_v22  ;;  %v1056_v42 = vpop.f32.mrf.mxu2 }
 0x2c0   : > { %v2519_v43 = vsel %vm2485_vm10, %v1056_v42, -1e+30 }
 0x2c1   : > { %v1064_v44 = vsel %vm845_vm9, %v2519_v43, -inf }
 0x2c9   : > { %977 = vrot.lane.b32.xlu0 %v2467_v63, %s2235_s17 }
 0x2d8   : > { %951 = vrot.lane.b32.xlu1 %v2459_v60, %s2235_s17 }
 0x2e0   : > { %1219 = vrot.lane.b32.xlu1 %v2464_v61, %s2236_s30 }
 0x2e8   : > { %1135 = vrot.lane.b32.xlu1 %v2467_v63, %s2237_s21 }
 0x31a   : > { %v905_v23 = vpop.xlane.xlu2 %904 }
 0x31b   : > { %v909_v24 = vsub.f32 %v901_v14, %v905_v23 }
 0x31d   : > { %v911_v25 = vmul.f32 1.442695, %v909_v24 }
 0x31f   : > { %2128 = vpow2.f32 %v911_v25 }
 0x325   : > { %v2129_v26 = vpop.eup %2128 }
 0x326   : > { %v915_v27 = vsel %vm845_vm9, %v2129_v26, 0.0 }
 0x327   : > { %916 = vadd.xlane.f32.xlu2 %v915_v27 }
 0x328   : > { %v908_v28 = vpop.xlane.xlu0 %907 }
 0x329   : > { %v910_v29 = vsub.f32 %v902_v18, %v908_v28 }
 0x32b   : > { %v913_v30 = vmul.f32 1.442695, %v910_v29 }
 0x32d   : > { %2130 = vpow2.f32 %v913_v30 }
 0x332   : > { %v1063_v31 = vpop.xlane.xlu1 %1062 }
 0x333   : > { %v2504_v32 = vpop.eup %2130  ;;  %v1067_v33 = vsub.f32 %v1059_v21, %v1063_v31 }
 0x334   : > { %v918_v34 = vsel %vm845_vm9, %v2504_v32, 0.0 }
 0x335   : > { %v1069_v35 = vmul.f32 1.442695, %v1067_v33  ;;  %919 = vadd.xlane.f32.xlu0 %v918_v34 }
 0x337   : > { %2132 = vpow2.f32 %v1069_v35 }
 0x33b   : > { %v978_v39 = vpop.permute.xlu0 %977 }
 0x33d   : > { %v2508_v36 = vpop.eup %2132 }
 0x33e   : > { %v1073_v37 = vsel %vm845_vm9, %v2508_v36, 0.0 }
 0x33f   : > { %1074 = vadd.xlane.f32.xlu2 %v1073_v37 }
 0x349   : > { %1221 = vrot.lane.b32.xlu0 %v2459_v60, %s2238_s23 }
 0x34a   : > { %v952_v38 = vpop.permute.xlu1 %951 }
 0x34b   : > { %972 = vmatpush.msra.mxu3 %v952_v38 }
 0x34d   : > { %998 = vmatpush.msrb.mxu3 %v978_v39  ;;  %v838_v39 = vld [vmem:[%s2377_s0] sm:$0xff] }
 0x352   : > { %v2514_v40 = vpop.permute.xlu1 %1219 }
 0x357   : > { %1109 = vrot.lane.b32.xlu2 %v2459_v60, %s2237_s21  ;;  %s1791_s21 = sld [smem:[#allocation4]] (!%p2074_p5) }
 0x35a   : > { %v1136_v41 = vpop.permute.xlu1 %1135 }
 0x35b   : > { %1156 = vmatpush.msra.mxu1 %v1136_v41 }
 0x380   : > { %1065 = vmax.xlane.f32.xlu2 %v1064_v44 }
 0x398   : > { %1247 = vrot.lane.b32.xlu2 %v2472_v0, %s2236_s30 }
 0x39a   : > { %v917_v45 = vpop.xlane.xlu2 %916 }
 0x39b   : > { %2134 = vrcp.f32 %v917_v45  ;;  %v932_v49 = vand.u32 2147483648, %v917_v45  ;;  %v930_v51 = vand.u32 2147483647, %v917_v45  ;;  %vm926_vm12 = vweird.f32 %v917_v45 }
 0x39d   : > { %v933_v54 = vor.u32 1.1754944e-38, %v932_v49  ;;  %vm931_vm14 = vcmp.eq.f32.partialorder %v930_v51, 8.507059e+37 }
 0x3a1   : > { %v2135_v46 = vpop.eup %2134 }
 0x3a2   : > { %v922_v47 = vmul.f32 %v2135_v46, %v917_v45  ;;  %vm927_vm11 = vweird.f32 %v2135_v46 }
 0x3a3   : > { %vm928_vm13 = vmor %vm926_vm12, %vm927_vm11 }
 0x3a4   : > { %v923_v48 = vsub.f32 1.0, %v922_v47 }
 0x3a6   : > { %v924_v50 = vmul.f32 %v2135_v46, %v923_v48 }
 0x3a8   : > { %v920_v52 = vpop.xlane.xlu0 %919  ;;  %v925_v53 = vadd.f32 %v2135_v46, %v924_v50 }
 0x3a9   : > { %2136 = vrcp.f32 %v920_v52  ;;  %v947_v2 = vand.u32 2147483648, %v920_v52  ;;  %v945_v4 = vand.u32 2147483647, %v920_v52  ;;  %vm941_vm0 = vweird.f32 %v920_v52 }
 0x3aa   : > { %v929_v55 = vsel %vm928_vm13, %v2135_v46, %v925_v53 }
 0x3ab   : > { %v934_v56 = vsel %vm931_vm14, %v933_v54, %v929_v55  ;;  %v948_v8 = vor.u32 1.1754944e-38, %v947_v2  ;;  %vm946_vm3 = vcmp.eq.f32.partialorder %v945_v4, 8.507059e+37 }
 0x3ac   : > { %v935_v57 = vmul.f32 %v2129_v26, %v934_v56 }
 0x3ae   : > { %2042 = vmatmul.msk.f32.vlgmr.msra.gmra.mxu3 %vm845_vm9, %v935_v57 }
 0x3af   : > { %v2137_v58 = vpop.eup %2136 }
 0x3b0   : > { %v937_v59 = vmul.f32 %v2137_v58, %v920_v52  ;;  %vm942_vm15 = vweird.f32 %v2137_v58 }
 0x3b1   : > { %vm943_vm2 = vmor %vm941_vm0, %vm942_vm15 }
 0x3b2   : > { %v938_v62 = vsub.f32 1.0, %v937_v59  ;;  %v1075_v1 = vpop.xlane.xlu2 %1074 }
 0x3b3   : > { %2138 = vrcp.f32 %v1075_v1  ;;  %v1090_v19 = vand.u32 2147483648, %v1075_v1  ;;  %v1088_v21 = vand.u32 2147483647, %v1075_v1  ;;  %vm1084_vm5 = vweird.f32 %v1075_v1 }
 0x3b4   : > { %v939_v3 = vmul.f32 %v2137_v58, %v938_v62 }
 0x3b5   : > { %v1091_v23 = vor.u32 1.1754944e-38, %v1090_v19  ;;  %vm1089_vm7 = vcmp.eq.f32.partialorder %v1088_v21, 8.507059e+37 }
 0x3b6   : > { %v940_v6 = vadd.f32 %v2137_v58, %v939_v3 }
 0x3b8   : > { %v944_v9 = vsel %vm943_vm2, %v2137_v58, %v940_v6 }
 0x3b9   : > { %v2139_v10 = vpop.eup %2138  ;;  %v949_v11 = vsel %vm946_vm3, %v948_v8, %v944_v9 }
 0x3ba   : > { %v1080_v13 = vmul.f32 %v2139_v10, %v1075_v1  ;;  %v1110_v14 = vpop.permute.xlu2 %1109  ;;  %v950_v16 = vmul.f32 %v2504_v32, %v949_v11  ;;  %vm1085_vm4 = vweird.f32 %v2139_v10  ;;  %v839_v32 = vld [vmem:[%s2377_s0 + $0x8] sm:$0xff] }
 0x3bb   : > { %1130 = vmatpush.msra.mxu3 %v1110_v14  ;;  %v1222_v17 = vpop.permute.xlu0 %1221  ;;  %vm1086_vm6 = vmor %vm1084_vm5, %vm1085_vm4  ;;  %1182 = vmatpush.msrb.mxu0 %v839_v32 }
 0x3bc   : > { %v1081_v18 = vsub.f32 1.0, %v1080_v13  ;;  %2043 = vmatmul.msk.f32.vlgmr.msrb.gmra.mxu3 %vm845_vm9, %v950_v16 }
 0x3bd   : > { %2054 = vmatpush.xpose.msk.msrb.mxu3 %vm845_vm9, %v1222_v17  ;;  %1211 = vmatpush.msra.mxu0 %v838_v39 }
 0x3be   : > { %v1082_v20 = vmul.f32 %v2139_v10, %v1081_v18 }
 0x3c0   : > { %v1083_v22 = vadd.f32 %v2139_v10, %v1082_v20 }
 0x3c2   : > { %v1087_v24 = vsel %vm1086_vm6, %v2139_v10, %v1083_v22 }
 0x3c3   : > { %v1092_v25 = vsel %vm1089_vm7, %v1091_v23, %v1087_v24 }
 0x3c4   : > { %v1093_v26 = vmul.f32 %v2508_v36, %v1092_v25 }
 0x3c6   : > { %2048 = vmatmul.msk.f32.vlgmr.msra.gmra.mxu3 %vm845_vm9, %v1093_v26 }
 0x3ce   : > { %2055 = vmatmul.msk.f32.vlgmr.msrb.gmra.mxu3 %vm845_vm9, %v2514_v40 }
 0x3f3   : > { %v1066_v27 = vpop.xlane.xlu2 %1065 }
 0x3f4   : > { %v1068_v28 = vsub.f32 %v2519_v43, %v1066_v27 }
 0x3f6   : > { %v1071_v29 = vmul.f32 1.442695, %v1068_v28 }
 0x3f8   : > { %2140 = vpow2.f32 %v1071_v29 }
 0x3fe   : > { %v2141_v30 = vpop.eup %2140 }
 0x3ff   : > { %v1076_v31 = vsel %vm845_vm9, %v2141_v30, 0.0 }
 0x400   : > { %1077 = vadd.xlane.f32.xlu0 %v1076_v31 }
 0x414   : > { %1249 = vrot.lane.b32.xlu0 %v2467_v63, %s2238_s23  ;;  %s2075_s23 = sld [smem:[#allocation4 + $0x1]] (!%p2074_p5) }
 0x41a   : > { %s1938_s12 = scalar_lea.vmem (!%p2074_p5), [#allocation2], %s2075_s23 }
 0x41c   : > { %1410 = vrot.lane.b32.xlu0 %v2459_v60, %s2239_s2 }
 0x424   : > { %1438 = vrot.lane.b32.xlu0 %v2467_v63, %s2239_s2  ;;  %s1792_s2 = scalar_lea.vmem (!%p2074_p5), [#allocation2], %s1791_s21 }
 0x431   : > { %v974_v33 = vpop.f32.mrf.mxu3 }
 0x43f   : > { %v1000_v34 = vpop.f32.mrf.mxu3 }
 0x449   : > { %v1132_v35 = vpop.f32.mrf.mxu3 }
 0x44a   : > { %2050 = vmatmul.msk.f32.vlgmr.msrb.gmra.mxu0 %vm845_vm9, %v1132_v35 }
 0x451   : > { %v1244_v36 = vpop.f32.mrf.mxu3 }
 0x452   : > { %v1275_v37 = vsel %vm2485_vm10, %v1244_v36, -1e+30 }
 0x453   : > { %v1277_v38 = vsel %vm845_vm9, %v1275_v37, -inf }
 0x454   : > { %1278 = vmax.xlane.f32.xlu1 %v1277_v38 }
 0x46d   : > { %1325 = vrot.lane.b32.xlu1 %v2459_v60, %s2240_s26 }
 0x473   : > { %v1078_v40 = vpop.xlane.xlu0 %1077 }
 0x474   : > { %2142 = vrcp.f32 %v1078_v40  ;;  %v1105_v44 = vand.u32 2147483648, %v1078_v40  ;;  %v1103_v46 = vand.u32 2147483647, %v1078_v40  ;;  %vm1099_vm11 = vweird.f32 %v1078_v40 }
 0x475   : > { %1436 = vrot.lane.b32.xlu1 %v2472_v0, %s2241_s24  ;;  %v1248_v0 = vpop.permute.xlu2 %1247 }
 0x476   : > { %v1106_v48 = vor.u32 1.1754944e-38, %v1105_v44  ;;  %vm1104_vm13 = vcmp.eq.f32.partialorder %v1103_v46, 8.507059e+37 }
 0x47a   : > { %v2143_v41 = vpop.eup %2142 }
 0x47b   : > { %v1095_v42 = vmul.f32 %v2143_v41, %v1078_v40  ;;  %vm1100_vm8 = vweird.f32 %v2143_v41 }
 0x47c   : > { %vm1101_vm12 = vmor %vm1099_vm11, %vm1100_vm8 }
 0x47d   : > { %v1096_v43 = vsub.f32 1.0, %v1095_v42 }
 0x47f   : > { %v1097_v45 = vmul.f32 %v2143_v41, %v1096_v43 }
 0x481   : > { %v1098_v47 = vadd.f32 %v2143_v41, %v1097_v45 }
 0x483   : > { %v1102_v49 = vsel %vm1101_vm12, %v2143_v41, %v1098_v47 }
 0x484   : > { %v1107_v50 = vsel %vm1104_vm13, %v1106_v48, %v1102_v49 }
 0x485   : > { %v1108_v51 = vmul.f32 %v2141_v30, %v1107_v50 }
 0x486   : > { %v1250_v52 = vpop.permute.xlu0 %1249 }
 0x487   : > { %2049 = vmatmul.msk.f32.vlgmr.msra.gmra.mxu1 %vm845_vm9, %v1108_v51 }
 0x488   : > { %2056 = vmatpush.xpose.msk.msrb.mxu1 %vm845_vm9, %v1250_v52 }
 0x48e   : > { %v1411_v53 = vpop.permute.xlu0 %1410 }
 0x48f   : > { %2057 = vmatmul.msk.f32.vlgmr.msrb.gmra.mxu1 %vm845_vm9, %v1248_v0  ;;  %2062 = vmatpush.xpose.msk.msrb.mxu0 %vm845_vm9, %v1411_v53 }
 0x496   : > { %v1439_v62 = vpop.permute.xlu0 %1438 }
 0x4c7   : > { %v1279_v54 = vpop.xlane.xlu1 %1278  ;;  %v1184_v22 = vpop.f32.mrf.mxu0 }
 0x4c8   : > { %v1283_v55 = vsub.f32 %v1275_v37, %v1279_v54 }
 0x4ca   : > { %v1285_v56 = vmul.f32 1.442695, %v1283_v55 }
 0x4cc   : > { %2144 = vpow2.f32 %v1285_v56 }
 0x4d2   : > { %v2145_v57 = vpop.eup %2144 }
 0x4d3   : > { %v1289_v58 = vsel %vm845_vm9, %v2145_v57, 0.0 }
 0x4d4   : > { %1290 = vadd.xlane.f32.xlu2 %v1289_v58 }
 0x4df   : > { %v1326_v59 = vpop.permute.xlu1 %1325 }
 0x4e0   : > { %1346 = vmatpush.msra.mxu3 %v1326_v59 }
 0x4e2   : > { %2064 = vmatpush.xpose.msk.msrb.mxu3 %vm845_vm9, %v1439_v62 }
 0x4e7   : > { %v1437_v21 = vpop.permute.xlu1 %1436 }
 0x4ec   : > { %1408 = vrot.lane.b32.xlu2 %v2464_v61, %s2241_s24  ;;  %s2741_s24 = sld [smem:[#allocation18_spill]] (!%p2074_p5) }
 0x504   : > { %v1158_v1 = vpop.f32.mrf.mxu1 }
 0x505   : > { %2051 = vmatmul.msk.f32.gmra.mxu0 %vm845_vm9, %v1158_v1 }
 0x50c   : > { %v1272_v2 = vpop.f32.mrf.mxu1 }
 0x50d   : > { %v1276_v3 = vsel %vm2485_vm10, %v1272_v2, -1e+30  ;;  %2052 = vmatmul.msk.f32.vlgmr.msra.gmra.mxu0 %vm845_vm9, %v974_v33  ;;  %v840_v33 = vld [vmem:[%s2377_s0 + $0x10] sm:$0xff] }
 0x50e   : > { %v1280_v4 = vsel %vm845_vm9, %v1276_v3, -inf  ;;  %1398 = vmatpush.msra.mxu2 %v840_v33 }
 0x50f   : > { %1281 = vmax.xlane.f32.xlu0 %v1280_v4 }
 0x515   : > { %2053 = vmatmul.msk.f32.gmra.mxu0 %vm845_vm9, %v1000_v34 }
 0x547   : > { %v1291_v6 = vpop.xlane.xlu2 %1290 }
 0x548   : > { %2146 = vrcp.f32 %v1291_v6  ;;  %v1306_v11 = vand.u32 2147483648, %v1291_v6  ;;  %v1304_v14 = vand.u32 2147483647, %v1291_v6  ;;  %vm1300_vm15 = vweird.f32 %v1291_v6 }
 0x54a   : > { %v1307_v17 = vor.u32 1.1754944e-38, %v1306_v11  ;;  %vm1305_vm2 = vcmp.eq.f32.partialorder %v1304_v14, 8.507059e+37 }
 0x54e   : > { %v2147_v8 = vpop.eup %2146 }
 0x54f   : > { %v1296_v9 = vmul.f32 %v2147_v8, %v1291_v6  ;;  %v1409_v10 = vpop.permute.xlu2 %1408  ;;  %vm1301_vm14 = vweird.f32 %v2147_v8 }
 0x550   : > { %2063 = vmatmul.msk.f32.vlgmr.msrb.gmra.mxu0 %vm845_vm9, %v1409_v10  ;;  %vm1302_vm0 = vmor %vm1300_vm15, %vm1301_vm14 }
 0x551   : > { %v1297_v61 = vsub.f32 1.0, %v1296_v9 }
 0x553   : > { %v1298_v13 = vmul.f32 %v2147_v8, %v1297_v61 }
 0x555   : > { %v1299_v16 = vadd.f32 %v2147_v8, %v1298_v13 }
 0x557   : > { %v1303_v18 = vsel %vm1302_vm0, %v2147_v8, %v1299_v16 }
 0x558   : > { %v1308_v19 = vsel %vm1305_vm2, %v1307_v17, %v1303_v18 }
 0x559   : > { %v1309_v20 = vmul.f32 %v2145_v57, %v1308_v19 }
 0x55b   : > { %2058 = vmatmul.msk.f32.vlgmr.msra.gmra.mxu3 %vm845_vm9, %v1309_v20 }
 0x563   : > { %2065 = vmatmul.msk.f32.vlgmr.msrb.gmra.mxu3 %vm845_vm9, %v1437_v21 }
 0x582   : > { %v1187_v23 = vpop.f32.mrf.mxu0  ;;  %v1282_v24 = vpop.xlane.xlu0 %1281 }
 0x583   : > { %v1284_v25 = vsub.f32 %v1276_v3, %v1282_v24 }
 0x585   : > { %v1287_v26 = vmul.f32 1.442695, %v1284_v25 }
 0x587   : > { %2148 = vpow2.f32 %v1287_v26 }
 0x58a   : > { %v1213_v27 = vpop.f32.mrf.mxu0 }
 0x58b   : > { %v2566_v28 = vadd.f32 %v1213_v27, %v1184_v22 }
 0x58d   : > { %v2149_v29 = vpop.eup %2148 }
 0x58e   : > { %v1292_v30 = vsel %vm845_vm9, %v2149_v29, 0.0 }
 0x58f   : > { %1293 = vadd.xlane.f32.xlu0 %v1292_v30 }
 0x592   : > { %v1216_v31 = vpop.f32.mrf.mxu0 }
 0x593   : > { %v2569_v32 = vadd.f32 %v1216_v31, %v1187_v23  ;;  %v841_v31 = vld [vmem:[%s2377_s0 + $0x18] sm:$0xff] }
 0x594   : > { %1587 = vmatpush.msra.mxu3 %v841_v31  ;;  %v1752_v31 = vld [vmem:[%s2404_s22 + $0x60] sm:$0xff] }
 0x5a3   : > { %1351 = vrot.lane.b32.xlu0 %v2467_v63, %s2240_s26 }
 0x5cd   : > { %v1433_v34 = vpop.f32.mrf.mxu0 }
 0x5ce   : > { %v1464_v35 = vsel %vm2485_vm10, %v1433_v34, -1e+30 }
 0x5cf   : > { %v1466_v36 = vsel %vm845_vm9, %v1464_v35, -inf }
 0x5d0   : > { %1467 = vmax.xlane.f32.xlu2 %v1466_v36 }
 0x5de   : > { %v1348_v37 = vpop.f32.mrf.mxu3 }
 0x5df   : > { %2060 = vmatmul.msk.f32.vlgmr.msra.gmra.mxu2 %vm845_vm9, %v1348_v37 }
 0x5e6   : > { %v1461_v38 = vpop.f32.mrf.mxu3 }
 0x5e7   : > { %v1465_v39 = vsel %vm2485_vm10, %v1461_v38, -1e+30 }
 0x5e8   : > { %v1469_v40 = vsel %vm845_vm9, %v1465_v39, -inf }
 0x5e9   : > { %1470 = vmax.xlane.f32.xlu1 %v1469_v40 }
 0x602   : > { %v1294_v41 = vpop.xlane.xlu0 %1293 }
 0x603   : > { %2150 = vrcp.f32 %v1294_v41  ;;  %v1321_v45 = vand.u32 2147483648, %v1294_v41  ;;  %v1319_v47 = vand.u32 2147483647, %v1294_v41  ;;  %vm1315_vm4 = vweird.f32 %v1294_v41 }
 0x605   : > { %v1322_v49 = vor.u32 1.1754944e-38, %v1321_v45  ;;  %vm1320_vm6 = vcmp.eq.f32.partialorder %v1319_v47, 8.507059e+37 }
 0x609   : > { %v2151_v42 = vpop.eup %2150 }
 0x60a   : > { %v1311_v43 = vmul.f32 %v2151_v42, %v1294_v41  ;;  %vm1316_vm3 = vweird.f32 %v2151_v42 }
 0x60b   : > { %vm1317_vm5 = vmor %vm1315_vm4, %vm1316_vm3 }
 0x60c   : > { %v1312_v44 = vsub.f32 1.0, %v1311_v43 }
 0x60e   : > { %v1313_v46 = vmul.f32 %v2151_v42, %v1312_v44 }
 0x610   : > { %v1314_v48 = vadd.f32 %v2151_v42, %v1313_v46 }
 0x612   : > { %v1318_v50 = vsel %vm1317_vm5, %v2151_v42, %v1314_v48 }
 0x613   : > { %v1323_v12 = vsel %vm1320_vm6, %v1322_v49, %v1318_v50 }
 0x614   : > { %v1324_v51 = vmul.f32 %v2149_v29, %v1323_v12 }
 0x615   : > { %v1352_v52 = vpop.permute.xlu0 %1351 }
 0x616   : > { %1372 = vmatpush.msra.mxu1 %v1352_v52 }
 0x617   : > { %2059 = vmatmul.msk.f32.vlgmr.msra.gmra.mxu1 %vm845_vm9, %v1324_v51 }
 0x643   : > { %v1468_v0 = vpop.xlane.xlu2 %1467 }
 0x644   : > { %v1472_v53 = vsub.f32 %v1464_v35, %v1468_v0 }
 0x646   : > { %v1474_v54 = vmul.f32 1.442695, %v1472_v53 }
 0x648   : > { %2152 = vpow2.f32 %v1474_v54  ;;  %v1664_v54 = vld [vmem:[%s2394_s5 + $0x18] sm:$0xff] }
 0x64e   : > { %v2153_v55 = vpop.eup %2152 }
 0x64f   : > { %v1478_v56 = vsel %vm845_vm9, %v2153_v55, 0.0 }
 0x650   : > { %1479 = vadd.xlane.f32.xlu2 %v1478_v56  ;;  %v1662_v56 = vld [vmem:[%s2394_s5 + $0x8] sm:$0xff] }
 0x65c   : > { %v1471_v57 = vpop.xlane.xlu1 %1470 }
 0x65d   : > { %v1473_v58 = vsub.f32 %v1465_v39, %v1471_v57  ;;  %v2117_v39 = vld [vmem:[%s2739_s20] ss:$0 sm:$0xff] }
 0x65e   : > { %v1661_v57 = vld [vmem:[%s2394_s5] sm:$0xff] }
 0x65f   : > { %v1476_v59 = vmul.f32 1.442695, %v1473_v58 }
 0x661   : > { %2154 = vpow2.f32 %v1476_v59 }
 0x662   : > { %v1400_v35 = vpop.f32.mrf.mxu2 }
 0x663   : > { %v1406_v36 = vadd.f32 %v1400_v35, %v2566_v28  ;;  %v1749_v35 = vld [vmem:[%s2404_s22 + $0x48] sm:$0xff] }
 0x667   : > { %v2155_v62 = vpop.eup %2154 }
 0x668   : > { %1514 = vrot.lane.b32.xlu2 %v2459_v60, %s2242_s29  ;;  %v1481_v1 = vsel %vm845_vm9, %v2155_v62, 0.0 }
 0x669   : > { %1482 = vadd.xlane.f32.xlu1 %v1481_v1 }
 0x682   : > { %1540 = vrot.lane.b32.xlu1 %v2467_v63, %s2242_s29 }
 0x694   : > { %v1374_v2 = vpop.f32.mrf.mxu1 }
 0x695   : > { %2061 = vmatmul.msk.f32.gmra.mxu2 %vm845_vm9, %v1374_v2 }
 0x6c3   : > { %v1480_v3 = vpop.xlane.xlu2 %1479 }
 0x6c4   : > { %2156 = vrcp.f32 %v1480_v3  ;;  %v1495_v10 = vand.u32 2147483648, %v1480_v3  ;;  %v1493_v11 = vand.u32 2147483647, %v1480_v3  ;;  %vm1489_vm7 = vweird.f32 %v1480_v3 }
 0x6c6   : > { %v1496_v13 = vor.u32 1.1754944e-38, %v1495_v10  ;;  %vm1494_vm11 = vcmp.eq.f32.partialorder %v1493_v11, 8.507059e+37  ;;  %v2119_v11 = vld [vmem:[%s699_s27] ss:$0 sm:$0xff] }
 0x6ca   : > { %v2157_v4 = vpop.eup %2156 }
 0x6cb   : > { %v1485_v6 = vmul.f32 %v2157_v4, %v1480_v3  ;;  %v1515_v8 = vpop.permute.xlu2 %1514  ;;  %vm1490_vm10 = vweird.f32 %v2157_v4 }
 0x6cc   : > { %1535 = vmatpush.msrb.mxu1 %v1515_v8  ;;  %vm1491_vm8 = vmor %vm1489_vm7, %vm1490_vm10 }
 0x6cd   : > { %v1486_v9 = vsub.f32 1.0, %v1485_v6 }
 0x6ce   : > { %1687 = vmatpush.msra.mxu1 %v1664_v54 }
 0x6cf   : > { %v1487_v61 = vmul.f32 %v2157_v4, %v1486_v9  ;;  %v2118_v9 = vld [vmem:[%s696_s16] ss:$0 sm:$0xff]  ;;  %s2742_s16 = sld [smem:[#allocation16_spill]] (!%p2074_p5) }
 0x6d1   : > { %v1488_v60 = vadd.f32 %v2157_v4, %v1487_v61 }
 0x6d3   : > { %v1492_v14 = vsel %vm1491_vm8, %v2157_v4, %v1488_v60 }
 0x6d4   : > { %v1497_v63 = vsel %vm1494_vm11, %v1496_v13, %v1492_v14 }
 0x6d5   : > { %v1498_v16 = vmul.f32 %v2153_v55, %v1497_v63  ;;  %v1663_v55 = vld [vmem:[%s2394_s5 + $0x10] sm:$0xff] }
 0x6d6   : > { %1688 = vmatpush.msra.mxu1 %v1663_v55 }
 0x6d7   : > { %2066 = vmatmul.msk.f32.vlgmr.msrb.gmra.mxu1 %vm845_vm9, %v1498_v16 }
 0x6d8   : > { %1689 = vmatpush.msra.mxu1 %v1662_v56 }
 0x6da   : > { %1690 = vmatpush.msra.mxu1 %v1661_v57 }
 0x6dc   : > { %v1483_v17 = vpop.xlane.xlu1 %1482 }
 0x6dd   : > { %2158 = vrcp.f32 %v1483_v17  ;;  %v1510_v23 = vand.u32 2147483648, %v1483_v17  ;;  %vm1504_vm13 = vweird.f32 %v1483_v17  ;;  %v1508_v24 = vand.u32 2147483647, %v1483_v17 }
 0x6df   : > { %v1511_v26 = vor.u32 1.1754944e-38, %v1510_v23  ;;  %vm1509_vm15 = vcmp.eq.f32.partialorder %v1508_v24, 8.507059e+37 }
 0x6e3   : > { %v2159_v18 = vpop.eup %2158 }
 0x6e4   : > { %v1500_v19 = vmul.f32 %v2159_v18, %v1483_v17  ;;  %vm1505_vm12 = vweird.f32 %v2159_v18 }
 0x6e5   : > { %vm1506_vm14 = vmor %vm1504_vm13, %vm1505_vm12 }
 0x6e6   : > { %v1501_v20 = vsub.f32 1.0, %v1500_v19 }
 0x6e8   : > { %v1502_v21 = vmul.f32 %v2159_v18, %v1501_v20 }
 0x6ea   : > { %v1503_v22 = vadd.f32 %v2159_v18, %v1502_v21 }
 0x6ec   : > { %v1507_v25 = vsel %vm1506_vm14, %v2159_v18, %v1503_v22 }
 0x6ed   : > { %v1512_v27 = vsel %vm1509_vm15, %v1511_v26, %v1507_v25 }
 0x6ee   : > { %v1513_v30 = vmul.f32 %v2155_v62, %v1512_v27  ;;  %v1755_v27 = vld [vmem:[%s2404_s22 + $0x78] sm:$0xff] }
 0x6ef   : > { %1760 = vmatpush.msrb.mxu2 %v1755_v27 }
 0x6f4   : > { %v1541_v29 = vpop.permute.xlu1 %1540 }
 0x6f5   : > { %1561 = vmatpush.msra.mxu0 %v1541_v29  ;;  %v1754_v29 = vld [vmem:[%s2404_s22 + $0x70] sm:$0xff] }
 0x6f6   : > { %2067 = vmatmul.msk.f32.vlgmr.msra.gmra.mxu0 %vm845_vm9, %v1513_v30  ;;  %1761 = vmatpush.msrb.mxu2 %v1754_v29  ;;  %v1753_v30 = vld [vmem:[%s2404_s22 + $0x68] sm:$0xff] }
 0x6f8   : > { %1762 = vmatpush.msrb.mxu2 %v1753_v30 }
 0x6fa   : > { %1763 = vmatpush.msrb.mxu2 %v1752_v31 }
 0x718   : > { %v1403_v43 = vpop.f32.mrf.mxu2 }
 0x719   : > { %v1407_v44 = vadd.f32 %v1403_v43, %v2569_v32  ;;  %v2120_v43 = vld [vmem:[%s707_s15] ss:$0 sm:$0xff]  ;;  %s2743_s15 = sld [smem:[#allocation17_spill]] (!%p2074_p5) }
 0x754   : > { %v1537_v33 = vpop.f32.mrf.mxu1 }
 0x755   : > { %2068 = vmatmul.msk.f32.vlgmr.msra.gmra.mxu3 %vm845_vm9, %v1537_v33  ;;  %v1751_v33 = vld [vmem:[%s2404_s22 + $0x58] sm:$0xff] }
 0x756   : > { %1764 = vmatpush.msrb.mxu2 %v1751_v33 }
 0x773   : > { %v1563_v34 = vpop.f32.mrf.mxu0 }
 0x774   : > { %2069 = vmatmul.msk.f32.gmra.mxu3 %vm845_vm9, %v1563_v34  ;;  %v1750_v34 = vld [vmem:[%s2404_s22 + $0x50] sm:$0xff] }
 0x775   : > { %1765 = vmatpush.msrb.mxu2 %v1750_v34 }
 0x777   : > { %1766 = vmatpush.msrb.mxu2 %v1749_v35 }
 0x7d8   : > { %v1589_v37 = vpop.f32.mrf.mxu3 }
 0x7d9   : > { %v1595_v38 = vadd.f32 %v1589_v37, %v1406_v36  ;;  %v1748_v36 = vld [vmem:[%s2404_s22 + $0x40] sm:$0xff]  ;;  %v1747_v37 = vld [vmem:[%s2404_s22 + $0x38] sm:$0xff] }
 0x7da   : > { %1767 = vmatpush.msrb.mxu2 %v1748_v36 }
 0x7db   : > { %v1597_v40 = vadd.f32 %v1595_v38, %v2420_v5  ;;  %v1746_v38 = vld [vmem:[%s2404_s22 + $0x30] sm:$0xff] }
 0x7dc   : > { %1768 = vmatpush.msrb.mxu2 %v1747_v37 }
 0x7dd   : > { %v2599_v41 = vadd.f32 %v2117_v39, %v1597_v40  ;;  %v1744_v40 = vld [vmem:[%s2404_s22 + $0x20] sm:$0xff] }
 0x7de   : > { %1769 = vmatpush.msrb.mxu2 %v1746_v38 }
 0x7df   : > { %v1607_v42 = vsel %vm732_vm1, %v2599_v41, 0.0 }
 0x7e0   : > { %1608 = vadd.xlane.f32.xlu0 %v1607_v42  ;;  %v1743_v42 = vld [vmem:[%s2404_s22 + $0x18] sm:$0xff] }
 0x7f7   : > { %v1592_v45 = vpop.f32.mrf.mxu3 }
 0x7f8   : > { %v1596_v28 = vadd.f32 %v1592_v45, %v1407_v44  ;;  %v1742_v44 = vld [vmem:[%s2404_s22 + $0x10] sm:$0xff] }
 0x7fa   : > { %v1598_v46 = vadd.f32 %v1596_v28, %v2424_v7  ;;  %v1741_v28 = vld [vmem:[%s2404_s22 + $0x8] sm:$0xff] }
 0x7fc   : > { %v2605_v47 = vadd.f32 %v2117_v39, %v1598_v46  ;;  %v1745_v39 = vld [vmem:[%s2404_s22 + $0x28] sm:$0xff] }
 0x7fd   : > { %1770 = vmatpush.msrb.mxu2 %v1745_v39 }
 0x7fe   : > { %v1610_v48 = vsel %vm732_vm1, %v2605_v47, 0.0 }
 0x7ff   : > { %1611 = vadd.xlane.f32.xlu2 %v1610_v48  ;;  %1771 = vmatpush.msrb.mxu2 %v1744_v40  ;;  %v1740_v48 = vld [vmem:[%s2404_s22] sm:$0xff] }
 0x801   : > { %1772 = vmatpush.msrb.mxu2 %v1743_v42 }
 0x803   : > { %1773 = vmatpush.msrb.mxu2 %v1742_v44 }
 0x805   : > { %1774 = vmatpush.msrb.mxu2 %v1741_v28 }
 0x807   : > { %1775 = vmatpush.msrb.mxu2 %v1740_v48 }
 0x853   : > { %v1609_v5 = vpop.xlane.xlu0 %1608 }
 0x854   : > { %v1613_v49 = vmul.f32 %v1609_v5, %v2428_v15 }
 0x856   : > { %v1615_v50 = vsub.f32 %v2599_v41, %v1613_v49 }
 0x858   : > { %v1617_v32 = vmul.f32 %v1615_v50, %v1615_v50 }
 0x85a   : > { %v1619_v12 = vsel %vm732_vm1, %v1617_v32, 0.0 }
 0x85b   : > { %1620 = vadd.xlane.f32.xlu1 %v1619_v12 }
 0x872   : > { %v1612_v7 = vpop.xlane.xlu2 %1611 }
 0x873   : > { %v1614_v51 = vmul.f32 %v1612_v7, %v2428_v15 }
 0x875   : > { %v1616_v52 = vsub.f32 %v2605_v47, %v1614_v51 }
 0x877   : > { %v1618_v0 = vmul.f32 %v1616_v52, %v1616_v52 }
 0x879   : > { %v1622_v53 = vsel %vm732_vm1, %v1618_v0, 0.0 }
 0x87a   : > { %1623 = vadd.xlane.f32.xlu0 %v1622_v53 }
 0x8ce   : > { %v1621_v58 = vpop.xlane.xlu1 %1620 }
 0x8cf   : > { %v1625_v59 = vmul.f32 %v1621_v58, %v2428_v15 }
 0x8d1   : > { %v1627_v62 = vadd.f32 1e-05, %v1625_v59 }
 0x8d3   : > { %2160 = vrsqrt.f32 %v1627_v62  ;;  %vm1635_vm0 = vweird.f32 %v1627_v62 }
 0x8d9   : > { %v2161_v1 = vpop.eup %2160 }
 0x8da   : > { %v1630_v2 = vmul.f32 %v2161_v1, %v1627_v62  ;;  %vm1636_vm9 = vweird.f32 %v2161_v1 }
 0x8db   : > { %vm1637_vm2 = vmor %vm1635_vm0, %vm1636_vm9 }
 0x8dc   : > { %v1631_v3 = vmul.f32 %v2161_v1, %v1630_v2 }
 0x8de   : > { %v1632_v4 = vmul.f32 0.5, %v1631_v3 }
 0x8e0   : > { %v1633_v6 = vsub.f32 1.5, %v1632_v4 }
 0x8e2   : > { %v1634_v8 = vmul.f32 %v2161_v1, %v1633_v6 }
 0x8e4   : > { %v1638_v10 = vsel %vm1637_vm2, %v2161_v1, %v1634_v8 }
 0x8e5   : > { %v1649_v61 = vmul.f32 %v1638_v10, %v1615_v50 }
 0x8e7   : > { %v1654_v60 = vmul.f32 %v2118_v9, %v1649_v61 }
 0x8e9   : > { %v1659_v13 = vadd.f32 %v2119_v11, %v1654_v60 }
 0x8eb   : > { %2070 = vmatmul.msk.f32.vlgmr.msra.gmra.mxu1 %vm732_vm1, %v1659_v13 }
 0x8ed   : > { %v1624_v14 = vpop.xlane.xlu0 %1623 }
 0x8ee   : > { %v1626_v63 = vmul.f32 %v1624_v14, %v2428_v15 }
 0x8f0   : > { %v1628_v16 = vadd.f32 1e-05, %v1626_v63 }
 0x8f2   : > { %2162 = vrsqrt.f32 %v1628_v16  ;;  %vm1645_vm4 = vweird.f32 %v1628_v16 }
 0x8f8   : > { %v2163_v17 = vpop.eup %2162 }
 0x8f9   : > { %v1640_v18 = vmul.f32 %v2163_v17, %v1628_v16  ;;  %vm1646_vm3 = vweird.f32 %v2163_v17 }
 0x8fa   : > { %vm1647_vm5 = vmor %vm1645_vm4, %vm1646_vm3 }
 0x8fb   : > { %v1641_v19 = vmul.f32 %v2163_v17, %v1640_v18 }
 0x8fd   : > { %v1642_v20 = vmul.f32 0.5, %v1641_v19 }
 0x8ff   : > { %v1643_v21 = vsub.f32 1.5, %v1642_v20 }
 0x901   : > { %v1644_v22 = vmul.f32 %v2163_v17, %v1643_v21 }
 0x903   : > { %v1648_v23 = vsel %vm1647_vm5, %v2163_v17, %v1644_v22  ;;  %v2121_v17 = vld [vmem:[%s715_s25] ss:$0 sm:$0xff] }
 0x904   : > { %v1650_v24 = vmul.f32 %v1648_v23, %v1616_v52 }
 0x906   : > { %v1655_v25 = vmul.f32 %v2118_v9, %v1650_v24 }
 0x908   : > { %v1660_v26 = vadd.f32 %v2119_v11, %v1655_v25 }
 0x90a   : > { %2071 = vmatmul.msk.f32.gmra.mxu1 %vm732_vm1, %v1660_v26 }
 0x968   : > { %v1692_v45 = vpop.f32.mrf.mxu1 }
 0x969   : > { %v1693_v46 = vadd.f32 %v2120_v43, %v1692_v45 }
 0x96b   : > { %v2072_v5 = vmul.f32 -1.702, %v1693_v46 }
 0x96d   : > { %v1702_v49 = vmul.f32 1.442695, %v2072_v5 }
 0x96f   : > { %2164 = vpow2.f32 %v1702_v49 }
 0x975   : > { %v2165_v50 = vpop.eup %2164 }
 0x976   : > { %v1706_v32 = vadd.f32 1.0, %v2165_v50 }
 0x978   : > { %2166 = vrcp.f32 %v1706_v32  ;;  %v1719_v52 = vand.u32 2147483648, %v1706_v32  ;;  %v1717_v53 = vand.u32 2147483647, %v1706_v32  ;;  %vm1713_vm10 = vweird.f32 %v1706_v32 }
 0x97a   : > { %v1720_v55 = vor.u32 1.1754944e-38, %v1719_v52  ;;  %vm1718_vm8 = vcmp.eq.f32.partialorder %v1717_v53, 8.507059e+37 }
 0x97e   : > { %v2167_v12 = vpop.eup %2166 }
 0x97f   : > { %v1709_v7 = vmul.f32 %v2167_v12, %v1706_v32  ;;  %vm1714_vm6 = vweird.f32 %v2167_v12 }
 0x980   : > { %vm1715_vm7 = vmor %vm1713_vm10, %vm1714_vm6 }
 0x981   : > { %v1710_v51 = vsub.f32 1.0, %v1709_v7 }
 0x983   : > { %v1711_v0 = vmul.f32 %v2167_v12, %v1710_v51 }
 0x985   : > { %v1712_v54 = vadd.f32 %v2167_v12, %v1711_v0 }
 0x987   : > { %v1716_v56 = vsel %vm1715_vm7, %v2167_v12, %v1712_v54  ;;  %v1695_v57 = vpop.f32.mrf.mxu1 }
 0x988   : > { %v1721_v58 = vsel %vm1718_vm8, %v1720_v55, %v1716_v56  ;;  %v1696_v59 = vadd.f32 %v2120_v43, %v1695_v57 }
 0x989   : > { %v1738_v62 = vmul.f32 %v1721_v58, %v1693_v46 }
 0x98a   : > { %v2073_v1 = vmul.f32 -1.702, %v1696_v59 }
 0x98b   : > { %1776 = vmatmul.f32.vlgmr.msrb.gmra.mxu2 %v1738_v62 }
 0x98c   : > { %v1704_v2 = vmul.f32 1.442695, %v2073_v1 }
 0x98e   : > { %2168 = vpow2.f32 %v1704_v2 }
 0x994   : > { %v2169_v3 = vpop.eup %2168 }
 0x995   : > { %v1707_v4 = vadd.f32 1.0, %v2169_v3 }
 0x997   : > { %2170 = vrcp.f32 %v1707_v4  ;;  %v1734_v10 = vand.u32 2147483648, %v1707_v4  ;;  %v1732_v11 = vand.u32 2147483647, %v1707_v4  ;;  %vm1728_vm12 = vweird.f32 %v1707_v4 }
 0x999   : > { %v1735_v13 = vor.u32 1.1754944e-38, %v1734_v10  ;;  %vm1733_vm14 = vcmp.eq.f32.partialorder %v1732_v11, 8.507059e+37 }
 0x99d   : > { %v2171_v6 = vpop.eup %2170 }
 0x99e   : > { %v1724_v8 = vmul.f32 %v2171_v6, %v1707_v4  ;;  %vm1729_vm11 = vweird.f32 %v2171_v6 }
 0x99f   : > { %vm1730_vm13 = vmor %vm1728_vm12, %vm1729_vm11 }
 0x9a0   : > { %v1725_v9 = vsub.f32 1.0, %v1724_v8 }
 0x9a2   : > { %v1726_v61 = vmul.f32 %v2171_v6, %v1725_v9 }
 0x9a4   : > { %v1727_v60 = vadd.f32 %v2171_v6, %v1726_v61 }
 0x9a6   : > { %v1731_v14 = vsel %vm1730_vm13, %v2171_v6, %v1727_v60 }
 0x9a7   : > { %v1736_v63 = vsel %vm1733_vm14, %v1735_v13, %v1731_v14 }
 0x9a8   : > { %v1739_v16 = vmul.f32 %v1736_v63, %v1696_v59 }
 0x9aa   : > { %1779 = vmatmul.f32.gmra.mxu2 %v1739_v16 }
 0xa0e   : > { %v1777_v18 = vpop.f32.mrf.mxu2 }
 0xa0f   : > { %v1778_v19 = vadd.f32 %v2121_v17, %v1777_v18 }
 0xa11   : > { %v1783_v20 = vadd.f32 %v1778_v19, %v2599_v41 }
 0xa13   : > { %1785 = vst.msk [vmem:[#allocation2] sm:$0xff] %vm732_vm1, %v1783_v20 }
 0xa2d   : > { %v1780_v21 = vpop.f32.mrf.mxu2 }
 0xa2e   : > { %v1781_v22 = vadd.f32 %v2121_v17, %v1780_v21  ;;  %1790 = sbr.rel (%p2074_p5) target bundleno = 3016 (0xbc8), region = 96 }
 0xa30   : > { %v1784_v23 = vadd.f32 %v1781_v22, %v2605_v47 }
 0xa32   : > { %1786 = vst.msk [vmem:[#allocation2 + $0x8] sm:$0xff] %vm732_vm1, %v1784_v23 }
 0xa33   : > { %vm1801_vm15 = vcmask 1040384   ;;  %vm1805_vm9 = vcmask 254976   ;;  %v1839_v34 = vld [vmem:[%s2741_s24 + $0x18] sm:$0xff]  ;;  %v1838_v35 = vld [vmem:[%s2741_s24 + $0x10] sm:$0xff]  ;;  %v1837_v36 = vld [vmem:[%s2741_s24 + $0x8] sm:$0xff] }
 0xa34   : > { %1855 = vmatpush.msra.mxu0 %v1839_v34  ;;  %v1836_v37 = vld [vmem:[%s2741_s24] sm:$0xff] }
 0xa35   : > { %v2172_v48 = vld [vmem:[%s2742_s16] ss:$0 sm:$0xff] }
 0xa36   : > { %1856 = vmatpush.msra.mxu0 %v1838_v35 }
 0xa38   : > { %1857 = vmatpush.msra.mxu0 %v1837_v36 }
 0xa39   : > { %v1793_v24 = vld [vmem:[%s1792_s2] sm:$0x1]  ;;  %v2076_v25 = vld [vmem:[%s1938_s12 + $0x8] sm:$0x1] }
 0xa3a   : > { %v1799_v26 = vrot.slane %v2076_v25, 7  ;;  %1858 = vmatpush.msra.mxu0 %v1836_v37 }
 0xa3c   : > { %v1802_v41 = vsel %vm1801_vm15, %v1793_v24, %v1799_v26 }
 0xa3d   : > { %v1806_v27 = vsel %vm1805_vm9, %v1802_v41, 0.0 }
 0xa3e   : > { %1807 = vadd.xlane.f32.xlu0 %v1806_v27 }
 0xab1   : > { %v1808_v29 = vpop.xlane.xlu0 %1807 }
 0xab2   : > { %v1809_v47 = vmul.f32 %v1808_v29, %v2428_v15 }
 0xab4   : > { %v1810_v30 = vsub.f32 %v1802_v41, %v1809_v47 }
 0xab6   : > { %v1811_v31 = vmul.f32 %v1810_v30, %v1810_v30 }
 0xab8   : > { %v1812_v33 = vsel %vm1805_vm9, %v1811_v31, 0.0 }
 0xab9   : > { %1813 = vadd.xlane.f32.xlu0 %v1812_v33 }
 0xb2c   : > { %v1814_v38 = vpop.xlane.xlu0 %1813 }
 0xb2d   : > { %v1815_v39 = vmul.f32 %v1814_v38, %v2428_v15  ;;  %v2173_v15 = vld [vmem:[%s2743_s15] ss:$0 sm:$0xff] }
 0xb2f   : > { %v1816_v40 = vadd.f32 1e-05, %v1815_v39 }
 0xb31   : > { %2174 = vrsqrt.f32 %v1816_v40  ;;  %vm1823_vm2 = vweird.f32 %v1816_v40 }
 0xb37   : > { %v2175_v42 = vpop.eup %2174 }
 0xb38   : > { %v1818_v43 = vmul.f32 %v2175_v42, %v1816_v40  ;;  %vm1824_vm0 = vweird.f32 %v2175_v42 }
 0xb39   : > { %vm1825_vm3 = vmor %vm1823_vm2, %vm1824_vm0 }
 0xb3a   : > { %v1819_v44 = vmul.f32 %v2175_v42, %v1818_v43 }
 0xb3c   : > { %v1820_v45 = vmul.f32 0.5, %v1819_v44 }
 0xb3e   : > { %v1821_v28 = vsub.f32 1.5, %v1820_v45 }
 0xb40   : > { %v1822_v46 = vmul.f32 %v2175_v42, %v1821_v28 }
 0xb42   : > { %v1826_v5 = vsel %vm1825_vm3, %v2175_v42, %v1822_v46 }
 0xb43   : > { %v1827_v49 = vmul.f32 %v1826_v5, %v1810_v30 }
 0xb45   : > { %v1831_v50 = vmul.f32 %v2172_v48, %v1827_v49 }
 0xb47   : > { %v1835_v32 = vadd.f32 %v2173_v15, %v1831_v50 }
 0xb49   : > { %2077 = vmatmul.msk.f32.vlgmr.msra.gmra.mxu0 %vm732_vm1, %v1835_v32 }
 0xbc6   : > { %v1860_v12 = vpop.f32.mrf.mxu0 }
 0xbc7   : > { %1863 = vst.msk [vmem:[#allocation5] sm:$0x3] %vm1805_vm9, %v1860_v12 }
 0xbc8 PF: > { %p2090_p6 = scmp.eq.s32.totalorder %s2348_s19, 1  ;;  %s2243_s22 = smov [#allocation5]  }
 0xbc9   : > { %s1870_s21 = sshll.u32 %s2243_s22, 4  ;;  %s2744_s12 = sld [smem:[#allocation19_spill]]  ;;  %s1871_s21 = int_to_ptr.vmem [resolvable:$true] %s1870_s21 }
 0xbcf   : > { %s1872_s25 = sshll.u32 %s2744_s12, 4  ;;  %s1873_s25 = int_to_ptr.hbm [resolvable:$true] %s1872_s25 }
 0xbd0   : > { %2087 = dma.vmem_to_hbm [thread:$0]  (%p2090_p6), %s1871_s21, 32, %s1873_s25, [#allocation6]  }
 0xbd1   : > { %2223 = dma.done.wait (%p2090_p6), [#allocation6], 32  }
 0xbd2   : > { %2225 = vsyncadd (%p2090_p6), [#allocation6], 4294967264 }
 0xbd3 PF: > { %s2745_s26 = sld [smem:[#allocation9_spill]] }
 0xbd9   : > { %s37_s0 = sadd.s32 1, %s2745_s26  }
 0xbda   : > { %p34_p7 = scmp.ge.s32.totalorder %s37_s0, 4  }
 0xbdc   :  { %36 = sbr.rel (!%p34_p7) target bundleno = 23 (0x17), region = 158 }
 0xbe1   :  { %1886 = vsyncpa [#allocation6], 1 }
 0xbe2   :  { %1888 = vsyncpa [#allocation6 + $0x1], 1 }

</bundles_post_ra>
